<compile_context>
chip_gen: v7x
topology: tpu7x:2x2x1
jax: 0.10.0
libtpu: 0.0.40
codegen_flags: <defaults>
</compile_context>

<pallas_src>
import math
import numpy as np
import jax
import jax.numpy as jnp
from jax.experimental import pallas as pl
from jax.experimental.pallas import tpu as pltpu


# ----------------------------------------------------------------------------
# Frequency-index / DCT-filter construction (host-side; matches the PyTorch
# get_freq_indices / MultiSpectralDCTLayer.get_dct_filter exactly).
# ----------------------------------------------------------------------------
def get_freq_indices(method):
    assert method in ['top1', 'top2', 'top4', 'top8', 'top16', 'top32',
                      'bot1', 'bot2', 'bot4', 'bot8', 'bot16', 'bot32',
                      'low1', 'low2', 'low4', 'low8', 'low16', 'low32']
    num_freq = int(method[3:])
    if 'top' in method:
        all_x = [0, 0, 6, 0, 0, 1, 1, 4, 5, 1, 3, 0, 0, 0, 3, 2,
                 4, 6, 3, 5, 5, 2, 6, 5, 5, 3, 3, 4, 2, 2, 6, 1]
        all_y = [0, 1, 0, 5, 2, 0, 2, 0, 0, 6, 0, 4, 6, 3, 5, 2,
                 6, 3, 3, 3, 5, 1, 1, 2, 4, 2, 1, 1, 3, 0, 5, 3]
    elif 'low' in method:
        all_x = [0, 0, 1, 1, 0, 2, 2, 1, 2, 0, 3, 4, 0, 1, 3, 0,
                 1, 2, 3, 4, 5, 0, 1, 2, 3, 4, 5, 6, 1, 2, 3, 4]
        all_y = [0, 1, 0, 1, 2, 0, 1, 2, 2, 3, 0, 0, 4, 3, 1, 5,
                 4, 3, 2, 1, 0, 6, 5, 4, 3, 2, 1, 0, 6, 5, 4, 3]
    else:  # bot
        all_x = [6, 1, 3, 3, 2, 4, 1, 2, 4, 4, 5, 1, 4, 6, 2, 5,
                 6, 1, 6, 2, 2, 4, 3, 3, 5, 5, 6, 2, 5, 5, 3, 6]
        all_y = [6, 4, 4, 6, 6, 3, 1, 4, 4, 5, 6, 5, 2, 2, 5, 1,
                 4, 3, 5, 0, 3, 1, 1, 2, 4, 2, 1, 1, 5, 3, 3, 3]
    return all_x[:num_freq], all_y[:num_freq]


def build_filter(pos, freq, POS):
    result = np.cos(np.pi * freq * (pos + 0.5) / POS) / math.sqrt(POS)
    if freq == 0:
        return result
    return result * math.sqrt(2)


def get_dct_filter(tile_x, tile_y, mapper_x, mapper_y, channel):
    dct = np.zeros((channel, tile_x, tile_y), dtype=np.float32)
    c_part = channel // len(mapper_x)
    for i, (u_x, v_y) in enumerate(zip(mapper_x, mapper_y)):
        fx = build_filter(np.arange(tile_x, dtype=np.float64), u_x, tile_x)
        fy = build_filter(np.arange(tile_y, dtype=np.float64), v_y, tile_y)
        dct[i * c_part:(i + 1) * c_part] = (fx[:, None] * fy[None, :]).astype(np.float32)
    return dct


# ----------------------------------------------------------------------------
# Pallas kernel.
# ----------------------------------------------------------------------------
def fca_kernel(x_ref, dct_ref, w1t_ref, w2t_ref, o_ref):
    x = x_ref[...]                                                # (TB, C, HW) f32
    # Multi-spectral DCT pooling: y[b, c] = sum_hw x[b, c, hw] * dct[c, hw]
    y = jnp.sum(x * dct_ref[...][None, :, :], axis=-1)            # (TB, C)
    # Squeeze: Linear(C -> hid, no bias) + ReLU  (tiny matmul on the MXU).
    h = jnp.dot(y, w1t_ref[...], preferred_element_type=jnp.float32)
    h = jnp.maximum(h, 0.0)                                        # (TB, hid)
    # Excite: Linear(hid -> C, no bias) + Sigmoid -- at (TB, C), not (TB, C*HW).
    logits = jnp.dot(h, w2t_ref[...], preferred_element_type=jnp.float32)
    z = 1.0 / (1.0 + jnp.exp(-logits))                             # (TB, C)
    # Channel re-weighting: free lane broadcast of z over the spatial axis.
    o_ref[...] = (x * z[:, :, None]).astype(o_ref.dtype)


# ----------------------------------------------------------------------------
# VMEM budgeting / batch-tile selection (padded footprints, per-generation cap).
# ----------------------------------------------------------------------------
def _pad8(v):
    return -(-v // 8) * 8


def _pad128(v):
    return -(-v // 128) * 128


def _vmem_budget_bytes():
    cap = 128 * 1024 * 1024
    try:
        info = pltpu.get_tpu_info()
        cap = int(getattr(info, "vmem_capacity_bytes", cap)) or cap
    except Exception:
        pass
    # ~70% of physical VMEM: ~90 MiB on v5e/v6e (128 MiB), ~45 MiB on v7x (64 MiB).
    return min(int(cap * 0.7), 96 * 1024 * 1024)


def _choose_batch_tile(n, row_bytes, weight_bytes, budget):
    """Largest batch tile TB that divides N, is sublane-aligned (or == N), and
    whose padded double-buffered in/out tiles + f32 temporaries fit the budget.
    Prefer TB >= 64 with a few grid steps when N allows (prefetch overlap /
    megacore balance); otherwise just take the largest fitting tile."""
    cands = [d for d in range(1, n + 1) if n % d == 0 and (d % 8 == 0 or d == n)]
    per_row = 6 * row_bytes            # 2x dbl-buffered in + out, plus ~2x f32 temps
    usable = max(budget - weight_bytes, per_row)
    fits = [d for d in cands if d * per_row <= usable]
    if not fits:
        return min(cands)
    pref = [d for d in fits if d >= 64 and n // d >= 4]
    if pref:
        return max(pref)
    pref = [d for d in fits if d >= 64 and n // d >= 2]
    if pref:
        return max(pref)
    return max(fits)


# ----------------------------------------------------------------------------
# Wrapper.
# ----------------------------------------------------------------------------
def multispectral_attention(x, dct_weight, w1, w2):
    """x: (N, C, H, W) f32.  dct_weight: (C, H, W).
    w1: (C//r, C), w2: (C, C//r)  (PyTorch nn.Linear weights, no bias)."""
    n, c, hgt, wid = x.shape
    hw = hgt * wid
    hid = w1.shape[0]

    x3 = x.reshape(n, c, hw)                 # free contiguous flatten of NCHW
    dct2 = dct_weight.reshape(c, hw)
    # In a real model these transposes would be precomputed once as parameters.
    w1t = jnp.asarray(w1).T                  # (C, hid)
    w2t = jnp.asarray(w2).T                  # (hid, C)

    itemsize = x.dtype.itemsize
    budget = _vmem_budget_bytes()
    row_bytes = _pad8(c) * _pad128(hw) * itemsize
    weight_bytes = 2 * 4 * (_pad8(c) * _pad128(hw)       # dct
                            + _pad8(c) * _pad128(hid)    # w1t
                            + _pad8(hid) * _pad128(c))   # w2t
    tb = _choose_batch_tile(n, row_bytes, weight_bytes, budget)

    out3 = pl.pallas_call(
        fca_kernel,
        out_shape=jax.ShapeDtypeStruct((n, c, hw), x.dtype),
        grid_spec=pltpu.PrefetchScalarGridSpec(
            num_scalar_prefetch=0,
            grid=(n // tb,),
            in_specs=[
                pl.BlockSpec((tb, c, hw), lambda i: (i, 0, 0)),   # x batch tile
                pl.BlockSpec((c, hw), lambda i: (0, 0)),          # dct (grid-constant)
                pl.BlockSpec((c, hid), lambda i: (0, 0)),         # w1.T (grid-constant)
                pl.BlockSpec((hid, c), lambda i: (0, 0)),         # w2.T (grid-constant)
            ],
            out_specs=pl.BlockSpec((tb, c, hw), lambda i: (i, 0, 0)),
        ),
        compiler_params=pltpu.CompilerParams(
            dimension_semantics=("parallel",),
            vmem_limit_bytes=budget,
        ),
    )(x3, dct2, w1t, w2t)

    return out3.reshape(n, c, hgt, wid)


# ----------------------------------------------------------------------------
# Self test.
# ----------------------------------------------------------------------------
if __name__ == "__main__":
    # Module hyper-parameters (small, consistent with the PyTorch __init__).
    channel = 32
    reduction = 16
    dct_h = dct_w = 8
    freq_sel_method = 'top16'
    n = 16

    # Build the DCT filter exactly as the module does.
    mapper_x, mapper_y = get_freq_indices(freq_sel_method)
    mapper_x = [tx * (dct_h // 2) for tx in mapper_x]
    mapper_y = [ty * (dct_w // 2) for ty in mapper_y]
    dct_np = get_dct_filter(dct_h, dct_w, mapper_x, mapper_y, channel)
    dct_weight = jnp.asarray(dct_np)

    # Deterministic parameter / input init.
    key = jax.random.PRNGKey(0)
    k_x, k_w1, k_w2 = jax.random.split(key, 3)
    hid = channel // reduction
    x = jax.random.normal(k_x, (n, channel, dct_h, dct_w), dtype=jnp.float32)
    w1 = jax.random.normal(k_w1, (hid, channel), dtype=jnp.float32) * (1.0 / math.sqrt(channel))
    w2 = jax.random.normal(k_w2, (channel, hid), dtype=jnp.float32) * (1.0 / math.sqrt(hid))

    out = multispectral_attention(x, dct_weight, w1, w2)
    out = jax.block_until_ready(out)

    # float64 numpy reference in the original (unfused) op order.
    xn = np.asarray(x, dtype=np.float64)
    dn = np.asarray(dct_np, dtype=np.float64)
    w1n = np.asarray(w1, dtype=np.float64)
    w2n = np.asarray(w2, dtype=np.float64)
    yn = (xn * dn[None]).sum(axis=(2, 3))
    hn = np.maximum(yn @ w1n.T, 0.0)
    zn = 1.0 / (1.0 + np.exp(-(hn @ w2n.T)))
    ref = xn * zn[:, :, None, None]

    assert out.shape == (n, channel, dct_h, dct_w)
    assert np.allclose(np.asarray(out, dtype=np.float64), ref, atol=1e-4, rtol=1e-4)

    print("KERNEL_OK")
</pallas_src>

<mosaic_0001>
module attributes {stable_mosaic.version = 11 : i64} {
  func.func @fca_kernel(%arg0: i32, %arg1: memref<16x32x64xf32, #tpu.memory_space<vmem>>, %arg2: memref<32x64xf32, #tpu.memory_space<vmem>>, %arg3: memref<32x2xf32, #tpu.memory_space<vmem>>, %arg4: memref<2x32xf32, #tpu.memory_space<vmem>>, %arg5: memref<16x32x64xf32, #tpu.memory_space<vmem>>) attributes {dimension_semantics = [#tpu.dimension_semantics<parallel>], iteration_bounds = array<i64: 1>, scalar_prefetch = 0 : i64, scratch_operands = 0 : i64, tpu.core_type = #tpu.core_type<tc>, window_params = [{transform_indices = @transform_0, window_bounds = array<i64: 16, 32, 64>}, {pipeline_mode = #tpu.pipeline_mode<synchronous>, transform_indices = @transform_1, window_bounds = array<i64: 32, 64>}, {pipeline_mode = #tpu.pipeline_mode<synchronous>, transform_indices = @transform_2, window_bounds = array<i64: 32, 2>}, {pipeline_mode = #tpu.pipeline_mode<synchronous>, transform_indices = @transform_3, window_bounds = array<i64: 2, 32>}, {transform_indices = @transform_4, window_bounds = array<i64: 16, 32, 64>}]} {
    %c0 = arith.constant 0 : index
    %c0_0 = arith.constant 0 : index
    %c0_1 = arith.constant 0 : index
    %0 = vector.load %arg1[%c0, %c0_0, %c0_1] : memref<16x32x64xf32, #tpu.memory_space<vmem>>, vector<16x32x64xf32>
    %c0_2 = arith.constant 0 : index
    %c0_3 = arith.constant 0 : index
    %1 = vector.load %arg2[%c0_2, %c0_3] : memref<32x64xf32, #tpu.memory_space<vmem>>, vector<32x64xf32>
    %2 = vector.shape_cast %1 : vector<32x64xf32> to vector<1x32x64xf32>
    %3 = vector.broadcast %2 : vector<1x32x64xf32> to vector<16x32x64xf32>
    %4 = arith.mulf %0, %3 : vector<16x32x64xf32>
    %cst = arith.constant dense<0.000000e+00> : vector<16x32xf32>
    %5 = vector.multi_reduction <add>, %4, %cst [2] : vector<16x32x64xf32> to vector<16x32xf32>
    %c0_4 = arith.constant 0 : index
    %c0_5 = arith.constant 0 : index
    %6 = vector.load %arg3[%c0_4, %c0_5] : memref<32x2xf32, #tpu.memory_space<vmem>>, vector<32x2xf32>
    %cst_6 = arith.constant dense<0.000000e+00> : vector<16x2xf32>
    %7 = tpu.matmul %5, %6, %cst_6 {dimension_numbers = #tpu.dot_dimension_numbers<[1], [0], [0], [1], [0, 0, 1, 1], [], []>} : vector<16x32xf32>, vector<32x2xf32>, vector<16x2xf32> -> vector<16x2xf32>
    %cst_7 = arith.constant 0.000000e+00 : f32
    %8 = vector.broadcast %cst_7 : f32 to vector<16x2xf32>
    %9 = arith.maximumf %7, %8 : vector<16x2xf32>
    %c0_8 = arith.constant 0 : index
    %c0_9 = arith.constant 0 : index
    %10 = vector.load %arg4[%c0_8, %c0_9] : memref<2x32xf32, #tpu.memory_space<vmem>>, vector<2x32xf32>
    %cst_10 = arith.constant dense<0.000000e+00> : vector<16x32xf32>
    %11 = tpu.matmul %9, %10, %cst_10 {dimension_numbers = #tpu.dot_dimension_numbers<[1], [0], [0], [1], [0, 0, 1, 1], [], []>} : vector<16x2xf32>, vector<2x32xf32>, vector<16x32xf32> -> vector<16x32xf32>
    %cst_11 = arith.constant 0.000000e+00 : f32
    %12 = vector.broadcast %cst_11 : f32 to vector<16x32xf32>
    %13 = arith.subf %12, %11 : vector<16x32xf32>
    %14 = math.exp %13 : vector<16x32xf32>
    %cst_12 = arith.constant 1.000000e+00 : f32
    %15 = vector.broadcast %cst_12 : f32 to vector<16x32xf32>
    %16 = arith.addf %15, %14 : vector<16x32xf32>
    %cst_13 = arith.constant 1.000000e+00 : f32
    %17 = vector.broadcast %cst_13 : f32 to vector<16x32xf32>
    %18 = arith.divf %17, %16 : vector<16x32xf32>
    %19 = vector.shape_cast %18 : vector<16x32xf32> to vector<16x32x1xf32>
    %20 = vector.broadcast %19 : vector<16x32x1xf32> to vector<16x32x64xf32>
    %21 = arith.mulf %0, %20 : vector<16x32x64xf32>
    %c0_14 = arith.constant 0 : index
    %c0_15 = arith.constant 0 : index
    %c0_16 = arith.constant 0 : index
    %22 = vector.load %arg5[%c0_14, %c0_15, %c0_16] : memref<16x32x64xf32, #tpu.memory_space<vmem>>, vector<16x32x64xf32>
    tpu.vector_store %arg5[%c0_14, %c0_15, %c0_16], %21 {strides = array<i32>} : memref<16x32x64xf32, #tpu.memory_space<vmem>>, vector<16x32x64xf32>,
    return
  }
  func.func @transform_0(%arg0: i32) -> (i32, i32, i32) {
    %c0_i32 = arith.constant 0 : i32
    %c0_i32_0 = arith.constant 0 : i32
    %c0_i32_1 = arith.constant 0 : i32
    return %arg0, %c0_i32, %c0_i32_0 : i32, i32, i32
  }
  func.func @transform_1(%arg0: i32) -> (i32, i32) {
    %c0_i32 = arith.constant 0 : i32
    %c0_i32_0 = arith.constant 0 : i32
    %c0_i32_1 = arith.constant 0 : i32
    return %c0_i32, %c0_i32_0 : i32, i32
  }
  func.func @transform_2(%arg0: i32) -> (i32, i32) {
    %c0_i32 = arith.constant 0 : i32
    %c0_i32_0 = arith.constant 0 : i32
    %c0_i32_1 = arith.constant 0 : i32
    return %c0_i32, %c0_i32_0 : i32, i32
  }
  func.func @transform_3(%arg0: i32) -> (i32, i32) {
    %c0_i32 = arith.constant 0 : i32
    %c0_i32_0 = arith.constant 0 : i32
    %c0_i32_1 = arith.constant 0 : i32
    return %c0_i32, %c0_i32_0 : i32, i32
  }
  func.func @transform_4(%arg0: i32) -> (i32, i32, i32) {
    %c0_i32 = arith.constant 0 : i32
    %c0_i32_0 = arith.constant 0 : i32
    %c0_i32_1 = arith.constant 0 : i32
    return %arg0, %c0_i32, %c0_i32_0 : i32, i32, i32
  }
}

</mosaic_0001>

<bundles_post_ra>
// kernel: tpu_custom_call.1
= control target key start
LH: loop header
LB: loop body
LE: loop exit
PB: predicated region body
PF: predicated region fallthrough
CT: control target
= control target key end

     0   :  { %9 = vsyncpa [#allocation3], 0  ;;  %s2350_s0 = inlined_call_operand.hbm [shape: f32[16,32,64], index: 0, kind: input, shape index: {}]   ;;  %s2351_s1 = inlined_call_operand.hbm [shape: f32[32,64], index: 1, kind: input, shape index: {}]   ;;  %s2352_s2 = inlined_call_operand.hbm [shape: f32[32,2], index: 2, kind: input, shape index: {}]   ;;  %s2353_s3 = inlined_call_operand.hbm [shape: f32[2,32], index: 3, kind: input, shape index: {}]   ;;  %s2354_s4 = inlined_call_operand.hbm [shape: f32[16,32,64], index: 4, kind: output, shape index: {}]  }
   0x1   :  { %10 = vsyncpa [#allocation6], 0 }
   0x2   :  { %11 = vsyncpa [#allocation9], 0 }
   0x3   :  { %12 = vsyncpa [#allocation4], 0  ;;  %s1646_s15 = smov [#allocation5]   ;;  %s1647_s17 = smov [#allocation2]  }
   0x4   :  { %s30_s16 = sshll.u32 %s1646_s15, 4  ;;  %s18_s18 = sshll.u32 %s1647_s17, 4  ;;  %s31_s16 = int_to_ptr.vmem [resolvable:$true] %s30_s16  ;;  %s1678_s18 = int_to_ptr.vmem [resolvable:$true] %s18_s18 }
   0x5   :  { %s1528_s21 = scalar_lea.hbm %s2351_s1, 512 }
   0x6   :  { %p1529_p0 = scmp.ne.s32.totalorder %s2351_s1, %s1528_s21  ;;  %p1532_p1 = scmp.lt.u32.totalorder %s1528_s21, %s2351_s1 }
   0x8   :  { %p1534_p2 = pnand %p1532_p1, %p1529_p0 }
   0xa   :  { %1537 = shalt.err (!%p1534_p2)
}
   0xb   :  { %s1538_s26 = scalar_lea.vmem %s31_s16, 512  ;;  %p1543_p4 = scmp.lt.s32.totalorder %s31_s16, %s31_s16 }
   0xc   :  { %p1539_p3 = scmp.ne.s32.totalorder %s31_s16, %s1538_s26  ;;  %p1544_p5 = scmp.lt.s32.totalorder %s1538_s26, %s1538_s26 }
   0xe   :  { %p1545_p6 = por %p1544_p5, %p1543_p4 }
  0x10   :  { %p1546_p7 = pnand %p1545_p6, %p1539_p3 }
  0x12   :  { %1549 = shalt.err (!%p1546_p7)
}
  0x13   :  { %s1648_s27 = smov 128   ;;  %s1649_s28 = smov 8  }
  0x14   :  { %36 = dma.hbm_to_vmem [thread:$0]  %s2351_s1, 512, %s31_s16, [#allocation6], %s1648_s27, %s1648_s27, %s1649_s28  }
  0x15   :  { %s1550_s7 = scalar_lea.hbm %s2350_s0, 8192 }
  0x16   :  { %p1551_p8 = scmp.ne.s32.totalorder %s2350_s0, %s1550_s7  ;;  %p1554_p9 = scmp.lt.u32.totalorder %s1550_s7, %s2350_s0 }
  0x18   :  { %p1556_p10 = pnand %p1554_p9, %p1551_p8 }
  0x1a   :  { %1559 = shalt.err (!%p1556_p10)
}
  0x1b   :  { %s1560_s12 = scalar_lea.vmem %s1678_s18, 8192  ;;  %p1565_p12 = scmp.lt.s32.totalorder %s1678_s18, %s1678_s18 }
  0x1c   :  { %p1561_p11 = scmp.ne.s32.totalorder %s1678_s18, %s1560_s12  ;;  %p1566_p13 = scmp.lt.s32.totalorder %s1560_s12, %s1560_s12 }
  0x1e   :  { %p1567_p0 = por %p1566_p13, %p1565_p12 }
  0x20   :  { %p1568_p1 = pnand %p1567_p0, %p1561_p11 }
  0x22   :  { %1571 = shalt.err (!%p1568_p1)
}
  0x23   :  { %24 = dma.hbm_to_vmem [thread:$0]  %s2350_s0, 8192, %s1678_s18, [#allocation3], %s1648_s27, %s1648_s27, %s1649_s28  }
  0x24   :  { %s1650_s14 = smov [#allocation7]   ;;  %s1651_s16 = smov [#allocation8]  }
  0x25   :  { %s42_s15 = sshll.u32 %s1650_s14, 4  ;;  %s55_s17 = sshll.u32 %s1651_s16, 4  ;;  %s43_s15 = int_to_ptr.vmem [resolvable:$true] %s42_s15  ;;  %s56_s17 = int_to_ptr.vmem [resolvable:$true] %s55_s17 }
  0x26   :  { %s1572_s21 = scalar_lea.hbm %s2352_s2, 512 }
  0x27   :  { %p1573_p2 = scmp.ne.s32.totalorder %s2352_s2, %s1572_s21  ;;  %p1576_p3 = scmp.lt.u32.totalorder %s1572_s21, %s2352_s2 }
  0x29   :  { %p1578_p4 = pnand %p1576_p3, %p1573_p2 }
  0x2b   :  { %1581 = shalt.err (!%p1578_p4)
}
  0x2c   :  { %s1582_s0 = scalar_lea.vmem %s43_s15, 512  ;;  %p1587_p6 = scmp.lt.s32.totalorder %s43_s15, %s43_s15 }
  0x2d   :  { %p1583_p5 = scmp.ne.s32.totalorder %s43_s15, %s1582_s0  ;;  %p1588_p7 = scmp.lt.s32.totalorder %s1582_s0, %s1582_s0 }
  0x2f   :  { %p1589_p8 = por %p1588_p7, %p1587_p6 }
  0x31   :  { %p1590_p9 = pnand %p1589_p8, %p1583_p5 }
  0x33   :  { %1593 = shalt.err (!%p1590_p9)
}
  0x34   :  { %48 = dma.hbm_to_vmem [thread:$0]  %s2352_s2, 512, %s43_s15, [#allocation6], %s1648_s27, %s1648_s27, %s1649_s28  }
  0x35   :  { %s1594_s5 = scalar_lea.hbm %s2353_s3, 32 }
  0x36   :  { %p1595_p10 = scmp.ne.s32.totalorder %s2353_s3, %s1594_s5  ;;  %p1598_p11 = scmp.lt.u32.totalorder %s1594_s5, %s2353_s3 }
  0x38   :  { %p1600_p12 = pnand %p1598_p11, %p1595_p10 }
  0x3a   :  { %1603 = shalt.err (!%p1600_p12)
}
  0x3b   :  { %s1604_s10 = scalar_lea.vmem %s56_s17, 32  ;;  %p1609_p0 = scmp.lt.s32.totalorder %s56_s17, %s56_s17 }
  0x3c   :  { %p1605_p13 = scmp.ne.s32.totalorder %s56_s17, %s1604_s10  ;;  %p1610_p1 = scmp.lt.s32.totalorder %s1604_s10, %s1604_s10 }
  0x3e   :  { %p1611_p2 = por %p1610_p1, %p1609_p0 }
  0x40   :  { %p1612_p3 = pnand %p1611_p2, %p1605_p13 }
  0x42   :  { %1615 = shalt.err (!%p1612_p3)
}
  0x43   :  { %58 = dma.hbm_to_vmem [thread:$0]  %s2353_s3, 32, %s56_s17, [#allocation9]  }
  0x44   :  { %1638 = dma.done.wait [#allocation3], 8192  }
  0x45   :  { %1639 = vsyncadd [#allocation3], 4294959104 }
  0x46   :  { %1640 = dma.done.wait [#allocation6], 1024  }
  0x47   :  { %1641 = vsyncadd [#allocation6], 4294966272 }
  0x48   :  { %1642 = dma.done.wait [#allocation9], 32  }
  0x49   :  { %1643 = vsyncadd [#allocation9], 4294967264  ;;  %v75_v0 = vld [vmem:[#allocation2 + $0x20] sm:$0xff]  ;;  %vm203_vm0 = vcmask 523264   ;;  %v76_v5 = vld [vmem:[#allocation2 + $0x28] sm:$0xff]  ;;  %vm475_vm1 = vcmask 130112  }
  0x4a   :  { %v1742_v1 = vld [vmem:[#allocation5] sm:$0xff]  ;;  %v1746_v6 = vld [vmem:[#allocation5 + $0x8] sm:$0xff]  ;;  %v77_v10 = vld [vmem:[#allocation2 + $0x30] sm:$0xff]  ;;  %vm482_vm2 = vcmask 195712   ;;  %vm489_vm3 = vcmask 261312   ;;  %vm776_vm4 = vcmask 1041409  }
  0x4b   :  { %v71_v2 = vld [vmem:[#allocation2] sm:$0xff]  ;;  %v143_v3 = vmul.f32 %v1742_v1, %v75_v0  ;;  %v72_v7 = vld [vmem:[#allocation2 + $0x8] sm:$0xff]  ;;  %v144_v8 = vmul.f32 %v1746_v6, %v76_v5  ;;  %v1750_v11 = vld [vmem:[#allocation5 + $0x10] sm:$0xff]  ;;  %vm778_vm5 = vcmask 1042434   ;;  %vm780_vm6 = vcmask 1043459   ;;  %s1652_s3 = smov [#allocation10]  }
  0x4c   :  { %v139_v4 = vmul.f32 %v1742_v1, %v71_v2  ;;  %v140_v9 = vmul.f32 %v1746_v6, %v72_v7  ;;  %v73_v12 = vld [vmem:[#allocation2 + $0x10] sm:$0xff]  ;;  %v145_v17 = vmul.f32 %v1750_v11, %v77_v10  ;;  %v80_v19 = vld [vmem:[#allocation2 + $0x48] sm:$0xff]  ;;  %v79_v20 = vld [vmem:[#allocation2 + $0x40] sm:$0xff]  ;;  %vm782_vm7 = vcmask 1044484   ;;  %s1415_s12 = sshll.u32 %s1652_s3, 4  ;;  %s1416_s12 = int_to_ptr.vmem [resolvable:$true] %s1415_s12 }
  0x4d   :  { %v216_v13 = vsel %vm203_vm0, %v143_v3, 0.0  ;;  %v219_v15 = vsel %vm203_vm0, %v144_v8, 0.0  ;;  %v141_v18 = vmul.f32 %v1750_v11, %v73_v12  ;;  %v148_v23 = vmul.f32 %v1746_v6, %v80_v19  ;;  %v104_v25 = vld [vmem:[#allocation2 + $0x108] sm:$0xff]  ;;  %v103_v26 = vld [vmem:[#allocation2 + $0x100] sm:$0xff]  ;;  %v78_v37 = vld [vmem:[#allocation2 + $0x38] sm:$0xff]  ;;  %s1616_s1 = scalar_lea.vmem %s1416_s12, 8192  ;;  %p1621_p5 = scmp.lt.s32.totalorder %s1416_s12, %s1416_s12 }
  0x4e   :  { %v204_v14 = vsel %vm203_vm0, %v139_v4, 0.0  ;;  %217 = vadd.xlane.f32.xlu1 %v216_v13  ;;  %v207_v16 = vsel %vm203_vm0, %v140_v9, 0.0  ;;  %v222_v21 = vsel %vm203_vm0, %v145_v17, 0.0  ;;  %v147_v24 = vmul.f32 %v1742_v1, %v79_v20  ;;  %v108_v31 = vld [vmem:[#allocation2 + $0x128] sm:$0xff]  ;;  %v107_v32 = vld [vmem:[#allocation2 + $0x120] sm:$0xff]  ;;  %v1770_v38 = vld [vmem:[#allocation5 + $0x18] sm:$0xff]  ;;  %p1617_p4 = scmp.ne.s32.totalorder %s1416_s12, %s1616_s1  ;;  %p1622_p6 = scmp.lt.s32.totalorder %s1616_s1, %s1616_s1 }
  0x4f   :  { %205 = vadd.xlane.f32.xlu0 %v204_v14  ;;  %v210_v22 = vsel %vm203_vm0, %v141_v18, 0.0  ;;  %v231_v27 = vsel %vm203_vm0, %v148_v23, 0.0  ;;  %v172_v29 = vmul.f32 %v1746_v6, %v104_v25  ;;  %v171_v30 = vmul.f32 %v1742_v1, %v103_v26  ;;  %v74_v39 = vld [vmem:[#allocation2 + $0x18] sm:$0xff]  ;;  %v83_v44 = vld [vmem:[#allocation2 + $0x60] sm:$0xff]  ;;  %v81_v45 = vld [vmem:[#allocation2 + $0x50] sm:$0xff] }
  0x50   :  { %v228_v28 = vsel %vm203_vm0, %v147_v24, 0.0  ;;  %v176_v35 = vmul.f32 %v1746_v6, %v108_v31  ;;  %v175_v36 = vmul.f32 %v1742_v1, %v107_v32  ;;  %v146_v42 = vmul.f32 %v1770_v38, %v78_v37  ;;  %v105_v50 = vld [vmem:[#allocation2 + $0x110] sm:$0xff]  ;;  %v84_v51 = vld [vmem:[#allocation2 + $0x68] sm:$0xff]  ;;  %v111_v56 = vld [vmem:[#allocation2 + $0x140] sm:$0xff]  ;;  %p1623_p7 = por %p1622_p6, %p1621_p5 }
  0x51   :  { %v303_v33 = vsel %vm203_vm0, %v172_v29, 0.0  ;;  %v300_v34 = vsel %vm203_vm0, %v171_v30, 0.0  ;;  %v142_v43 = vmul.f32 %v1770_v38, %v74_v39  ;;  %v151_v48 = vmul.f32 %v1742_v1, %v83_v44  ;;  %v109_v57 = vld [vmem:[#allocation2 + $0x130] sm:$0xff]  ;;  %v82_v62 = vld [vmem:[#allocation2 + $0x58] sm:$0xff]  ;;  %v112_v63 = vld [vmem:[#allocation2 + $0x148] sm:$0xff] }
  0x52   :  { %220 = vadd.xlane.f32.xlu1 %v219_v15  ;;  %v315_v40 = vsel %vm203_vm0, %v176_v35, 0.0  ;;  %v312_v41 = vsel %vm203_vm0, %v175_v36, 0.0  ;;  %v225_v46 = vsel %vm203_vm0, %v146_v42, 0.0  ;;  %v149_v49 = vmul.f32 %v1750_v11, %v81_v45  ;;  %v87_v5 = vld [vmem:[#allocation2 + $0x80] sm:$0xff]  ;;  %v85_v7 = vld [vmem:[#allocation2 + $0x70] sm:$0xff]  ;;  %v1796_v13 = vld [vmem:[#allocation2 + $0x118] sm:$0xff]  ;;  %p1624_p8 = pnand %p1623_p7, %p1617_p4 }
  0x53   :  { %208 = vadd.xlane.f32.xlu0 %v207_v16  ;;  %v213_v47 = vsel %vm203_vm0, %v142_v43, 0.0  ;;  %v240_v52 = vsel %vm203_vm0, %v151_v48, 0.0  ;;  %v173_v54 = vmul.f32 %v1750_v11, %v105_v50  ;;  %v152_v55 = vmul.f32 %v1746_v6, %v84_v51  ;;  %v88_v14 = vld [vmem:[#allocation2 + $0x88] sm:$0xff]  ;;  %v113_v19 = vld [vmem:[#allocation2 + $0x150] sm:$0xff]  ;;  %v110_v20 = vld [vmem:[#allocation2 + $0x138] sm:$0xff] }
  0x54   :  { %v234_v53 = vsel %vm203_vm0, %v149_v49, 0.0  ;;  %v179_v60 = vmul.f32 %v1742_v1, %v111_v56  ;;  %v177_v61 = vmul.f32 %v1750_v11, %v109_v57  ;;  %v150_v3 = vmul.f32 %v1770_v38, %v82_v62  ;;  %v116_v25 = vld [vmem:[#allocation2 + $0x168] sm:$0xff]  ;;  %v115_v26 = vld [vmem:[#allocation2 + $0x160] sm:$0xff]  ;;  %v89_v31 = vld [vmem:[#allocation2 + $0x90] sm:$0xff] }
  0x55   :  { %v306_v58 = vsel %vm203_vm0, %v173_v54, 0.0  ;;  %v243_v59 = vsel %vm203_vm0, %v152_v55, 0.0  ;;  %v180_v4 = vmul.f32 %v1746_v6, %v112_v63  ;;  %v155_v10 = vmul.f32 %v1742_v1, %v87_v5  ;;  %v86_v32 = vld [vmem:[#allocation2 + $0x78] sm:$0xff]  ;;  %v92_v37 = vld [vmem:[#allocation2 + $0xa8] sm:$0xff]  ;;  %v91_v39 = vld [vmem:[#allocation2 + $0xa0] sm:$0xff] }
  0x56   :  { %223 = vadd.xlane.f32.xlu1 %v222_v21  ;;  %v324_v0 = vsel %vm203_vm0, %v179_v60, 0.0  ;;  %v318_v2 = vsel %vm203_vm0, %v177_v61, 0.0  ;;  %v237_v8 = vsel %vm203_vm0, %v150_v3, 0.0  ;;  %v153_v12 = vmul.f32 %v1750_v11, %v85_v7  ;;  %v1819_v44 = vld [vmem:[#allocation2 + $0x170] sm:$0xff]  ;;  %v1821_v45 = vld [vmem:[#allocation2 + $0x158] sm:$0xff]  ;;  %v1829_v50 = vld [vmem:[#allocation2 + $0x188] sm:$0xff] }
  0x57   :  { %211 = vadd.xlane.f32.xlu0 %v210_v22  ;;  %v327_v9 = vsel %vm203_vm0, %v180_v4, 0.0  ;;  %v252_v15 = vsel %vm203_vm0, %v155_v10, 0.0  ;;  %v174_v17 = vmul.f32 %v1770_v38, %v1796_v13  ;;  %v156_v18 = vmul.f32 %v1746_v6, %v88_v14  ;;  %2371 = vst [vmem:[#allocation15_spill] sm:$0xff] %v1819_v44  ;;  %2372 = vst [vmem:[#allocation16_spill] sm:$0xff] %v1829_v50  ;;  %v1831_v51 = vld [vmem:[#allocation2 + $0x180] sm:$0xff]  ;;  %v93_v56 = vld [vmem:[#allocation2 + $0xb0] sm:$0xff] }
  0x58   :  { %v246_v16 = vsel %vm203_vm0, %v153_v12, 0.0  ;;  %v181_v23 = vmul.f32 %v1750_v11, %v113_v19  ;;  %v178_v24 = vmul.f32 %v1770_v38, %v110_v20  ;;  %v184_v29 = vmul.f32 %v1746_v6, %v116_v25  ;;  %2373 = vst [vmem:[#allocation17_spill] sm:$0xff] %v1831_v51  ;;  %v90_v57 = vld [vmem:[#allocation2 + $0x98] sm:$0xff]  ;;  %v96_v62 = vld [vmem:[#allocation2 + $0xc8] sm:$0xff]  ;;  %v95_v63 = vld [vmem:[#allocation2 + $0xc0] sm:$0xff] }
  0x59   :  { %v309_v21 = vsel %vm203_vm0, %v174_v17, 0.0  ;;  %v255_v22 = vsel %vm203_vm0, %v156_v18, 0.0  ;;  %v183_v30 = vmul.f32 %v1742_v1, %v115_v26  ;;  %v157_v35 = vmul.f32 %v1750_v11, %v89_v31  ;;  %v1847_v5 = vld [vmem:[#allocation2 + $0x190] sm:$0xff]  ;;  %v1849_v7 = vld [vmem:[#allocation2 + $0x178] sm:$0xff]  ;;  %v1857_v14 = vld [vmem:[#allocation2 + $0x1a8] sm:$0xff] }
  0x5a   :  { %232 = vadd.xlane.f32.xlu1 %v231_v27  ;;  %v330_v27 = vsel %vm203_vm0, %v181_v23, 0.0  ;;  %v154_v36 = vmul.f32 %v1770_v38, %v86_v32  ;;  %v160_v42 = vmul.f32 %v1746_v6, %v92_v37  ;;  %v159_v43 = vmul.f32 %v1742_v1, %v91_v39  ;;  %2374 = vst [vmem:[#allocation18_spill] sm:$0xff] %v1847_v5  ;;  %v97_v20 = vld [vmem:[#allocation2 + $0xd0] sm:$0xff]  ;;  %v100_v26 = vld [vmem:[#allocation2 + $0xe8] sm:$0xff] }
  0x5b   :  { %229 = vadd.xlane.f32.xlu0 %v228_v28  ;;  %v321_v28 = vsel %vm203_vm0, %v178_v24, 0.0  ;;  %v185_v48 = vmul.f32 %v1750_v11, %v1819_v44  ;;  %v182_v49 = vmul.f32 %v1770_v38, %v1821_v45  ;;  %v188_v54 = vmul.f32 %v1746_v6, %v1829_v50  ;;  %2375 = vst [vmem:[#allocation19_spill] sm:$0xff] %v1849_v7  ;;  %v1875_v32 = vld [vmem:[#allocation2 + $0x1b0] sm:$0xff]  ;;  %v1885_v39 = vld [vmem:[#allocation2 + $0x1c8] sm:$0xff] }
  0x5c   :  { %v187_v55 = vmul.f32 %v1742_v1, %v1831_v51  ;;  %v161_v60 = vmul.f32 %v1750_v11, %v93_v56  ;;  %v158_v61 = vmul.f32 %v1770_v38, %v90_v57  ;;  %v164_v3 = vmul.f32 %v1746_v6, %v96_v62  ;;  %2376 = vst [vmem:[#allocation20_spill] sm:$0xff] %v1857_v14  ;;  %v1901_v56 = vld [vmem:[#allocation2 + $0x1b8] sm:$0xff]  ;;  %v1911_v62 = vld [vmem:[#allocation2 + $0x1e0] sm:$0xff] }
  0x5d   :  { %v163_v4 = vmul.f32 %v1742_v1, %v95_v63  ;;  %v189_v10 = vmul.f32 %v1750_v11, %v1847_v5  ;;  %v186_v12 = vmul.f32 %v1770_v38, %v1849_v7  ;;  %v192_v18 = vmul.f32 %v1746_v6, %v1857_v14  ;;  %2378 = vst [vmem:[#allocation22_spill] sm:$0xff] %v1875_v32 }
  0x5e   :  { %304 = vadd.xlane.f32.xlu1 %v303_v33  ;;  %v339_v33 = vsel %vm203_vm0, %v184_v29, 0.0  ;;  %v165_v24 = vmul.f32 %v1750_v11, %v97_v20  ;;  %2380 = vst [vmem:[#allocation24_spill] sm:$0xff] %v1885_v39  ;;  %2383 = vst [vmem:[#allocation27_spill] sm:$0xff] %v1901_v56  ;;  %vm784_vm8 = vcmask 1045509   ;;  %vm786_vm9 = vcmask 1046534  }
  0x5f   :  { %301 = vadd.xlane.f32.xlu0 %v300_v34  ;;  %v336_v34 = vsel %vm203_vm0, %v183_v30, 0.0  ;;  %v345_v17 = vsel %vm203_vm0, %v186_v12, 0.0  ;;  %v168_v30 = vmul.f32 %v1746_v6, %v100_v26  ;;  %2385 = vst [vmem:[#allocation29_spill] sm:$0xff] %v1911_v62  ;;  %v398_v26 = vld [vmem:[#allocation7 + $0x10] sm:$0xff]  ;;  %vm788_vm10 = vcmask 1047559  }
  0x60   :  { %vm797_vm11 = vcmask 261120   ;;  %vm887_vm12 = vcmask 1041408   ;;  %vm880_vm13 = vcmask 15360  }
  0x62   :  { %316 = vadd.xlane.f32.xlu1 %v315_v40  ;;  %v258_v40 = vsel %vm203_vm0, %v157_v35, 0.0 }
  0x63   :  { %313 = vadd.xlane.f32.xlu0 %v312_v41  ;;  %v249_v41 = vsel %vm203_vm0, %v154_v36, 0.0  ;;  %v193_v36 = vmul.f32 %v1750_v11, %v1875_v32 }
  0x66   :  { %226 = vadd.xlane.f32.xlu1 %v225_v46  ;;  %v267_v46 = vsel %vm203_vm0, %v160_v42, 0.0 }
  0x67   :  { %214 = vadd.xlane.f32.xlu0 %v213_v47  ;;  %v264_v47 = vsel %vm203_vm0, %v159_v43, 0.0  ;;  %v196_v43 = vmul.f32 %v1746_v6, %v1885_v39 }
  0x6a   :  { %241 = vadd.xlane.f32.xlu1 %v240_v52  ;;  %v342_v52 = vsel %vm203_vm0, %v185_v48, 0.0  ;;  %v98_v48 = vld [vmem:[#allocation2 + $0xd8] sm:$0xff] }
  0x6b   :  { %235 = vadd.xlane.f32.xlu0 %v234_v53  ;;  %v333_v53 = vsel %vm203_vm0, %v182_v49, 0.0  ;;  %v375_v49 = vsel %vm203_vm0, %v196_v43, 0.0 }
  0x6e   :  { %307 = vadd.xlane.f32.xlu1 %v306_v58  ;;  %v351_v58 = vsel %vm203_vm0, %v188_v54, 0.0  ;;  %v166_v54 = vmul.f32 %v1770_v38, %v98_v48 }
  0x6f   :  { %244 = vadd.xlane.f32.xlu0 %v243_v59  ;;  %v348_v59 = vsel %vm203_vm0, %v187_v55, 0.0  ;;  %v1899_v55 = vld [vmem:[#allocation2 + $0x1d0] sm:$0xff] }
  0x70   :  { %2382 = vst [vmem:[#allocation26_spill] sm:$0xff] %v1899_v55 }
  0x72   :  { %325 = vadd.xlane.f32.xlu1 %v324_v0  ;;  %v270_v0 = vsel %vm203_vm0, %v161_v60, 0.0  ;;  %v194_v60 = vmul.f32 %v1770_v38, %v1901_v56 }
  0x73   :  { %319 = vadd.xlane.f32.xlu0 %v318_v2  ;;  %v261_v2 = vsel %vm203_vm0, %v158_v61, 0.0  ;;  %v1909_v61 = vld [vmem:[#allocation2 + $0x1e8] sm:$0xff] }
  0x74   :  { %2384 = vst [vmem:[#allocation28_spill] sm:$0xff] %v1909_v61 }
  0x76   :  { %238 = vadd.xlane.f32.xlu1 %v237_v8  ;;  %v279_v8 = vsel %vm203_vm0, %v164_v3, 0.0  ;;  %v199_v3 = vmul.f32 %v1742_v1, %v1911_v62 }
  0x77   :  { %328 = vadd.xlane.f32.xlu0 %v327_v9  ;;  %v276_v9 = vsel %vm203_vm0, %v163_v4, 0.0  ;;  %v1919_v4 = vld [vmem:[#allocation2 + $0x1d8] sm:$0xff] }
  0x78   :  { %2386 = vst [vmem:[#allocation30_spill] sm:$0xff] %v1919_v4  ;;  %v198_v12 = vmul.f32 %v1770_v38, %v1919_v4 }
  0x7a   :  { %253 = vadd.xlane.f32.xlu1 %v252_v15  ;;  %v1859_v15 = vld [vmem:[#allocation2 + $0x1a0] sm:$0xff] }
  0x7b   :  { %247 = vadd.xlane.f32.xlu0 %v246_v16  ;;  %2377 = vst [vmem:[#allocation21_spill] sm:$0xff] %v1859_v15  ;;  %v354_v16 = vsel %vm203_vm0, %v189_v10, 0.0  ;;  %v191_v19 = vmul.f32 %v1742_v1, %v1859_v15  ;;  %v384_v10 = vsel %vm203_vm0, %v199_v3, 0.0 }
  0x7d   :  { %v360_v23 = vsel %vm203_vm0, %v191_v19, 0.0 }
  0x7e   :  { %310 = vadd.xlane.f32.xlu1 %v309_v21  ;;  %v94_v21 = vld [vmem:[#allocation2 + $0xb8] sm:$0xff] }
  0x7f   :  { %256 = vadd.xlane.f32.xlu0 %v255_v22  ;;  %v363_v22 = vsel %vm203_vm0, %v192_v18, 0.0  ;;  %v162_v25 = vmul.f32 %v1770_v38, %v94_v21  ;;  %v134_v18 = vld [vmem:[#allocation2 + $0x1f8] sm:$0xff] }
  0x80   :  { %v202_v20 = vmul.f32 %v1770_v38, %v134_v18 }
  0x81   :  { %v273_v29 = vsel %vm203_vm0, %v162_v25, 0.0 }
  0x82   :  { %331 = vadd.xlane.f32.xlu1 %v330_v27  ;;  %v99_v27 = vld [vmem:[#allocation2 + $0xe0] sm:$0xff] }
  0x83   :  { %322 = vadd.xlane.f32.xlu0 %v321_v28  ;;  %v282_v28 = vsel %vm203_vm0, %v165_v24, 0.0  ;;  %v167_v31 = vmul.f32 %v1742_v1, %v99_v27  ;;  %v397_v24 = vld [vmem:[#allocation7 + $0x8] sm:$0xff]  ;;  %v399_v27 = vld [vmem:[#allocation7 + $0x18] sm:$0xff] }
  0x85   :  { %v288_v35 = vsel %vm203_vm0, %v167_v31, 0.0 }
  0x86   :  { %340 = vadd.xlane.f32.xlu1 %v339_v33  ;;  %v1877_v33 = vld [vmem:[#allocation2 + $0x198] sm:$0xff] }
  0x87   :  { %337 = vadd.xlane.f32.xlu0 %v336_v34  ;;  %2379 = vst [vmem:[#allocation23_spill] sm:$0xff] %v1877_v33  ;;  %v291_v34 = vsel %vm203_vm0, %v168_v30, 0.0  ;;  %v190_v37 = vmul.f32 %v1770_v38, %v1877_v33 }
  0x89   :  { %v357_v42 = vsel %vm203_vm0, %v190_v37, 0.0 }
  0x8a   :  { %259 = vadd.xlane.f32.xlu1 %v258_v40  ;;  %v1887_v40 = vld [vmem:[#allocation2 + $0x1c0] sm:$0xff] }
  0x8b   :  { %250 = vadd.xlane.f32.xlu0 %v249_v41  ;;  %2381 = vst [vmem:[#allocation25_spill] sm:$0xff] %v1887_v40  ;;  %v366_v41 = vsel %vm203_vm0, %v193_v36, 0.0 }
  0x8e   :  { %268 = vadd.xlane.f32.xlu1 %v267_v46  ;;  %v195_v46 = vmul.f32 %v1742_v1, %v1887_v40  ;;  %v381_v1 = vsel %vm203_vm0, %v198_v12, 0.0 }
  0x8f   :  { %265 = vadd.xlane.f32.xlu0 %v264_v47  ;;  %v101_v47 = vld [vmem:[#allocation2 + $0xf0] sm:$0xff] }
  0x92   :  { %343 = vadd.xlane.f32.xlu1 %v342_v52  ;;  %v372_v52 = vsel %vm203_vm0, %v195_v46, 0.0 }
  0x93   :  { %334 = vadd.xlane.f32.xlu0 %v333_v53  ;;  %v169_v53 = vmul.f32 %v1750_v11, %v101_v47 }
  0x95   :  { %v294_v57 = vsel %vm203_vm0, %v169_v53, 0.0 }
  0x96   :  { %352 = vadd.xlane.f32.xlu1 %v351_v58  ;;  %v285_v58 = vsel %vm203_vm0, %v166_v54, 0.0 }
  0x97   :  { %349 = vadd.xlane.f32.xlu0 %v348_v59  ;;  %v197_v59 = vmul.f32 %v1750_v11, %v1899_v55 }
  0x99   :  { %v378_v63 = vsel %vm203_vm0, %v197_v59, 0.0 }
  0x9a   :  { %271 = vadd.xlane.f32.xlu1 %v270_v0  ;;  %v369_v0 = vsel %vm203_vm0, %v194_v60, 0.0 }
  0x9b   :  { %262 = vadd.xlane.f32.xlu0 %v261_v2  ;;  %v200_v2 = vmul.f32 %v1746_v6, %v1909_v61 }
  0x9e   :  { %280 = vadd.xlane.f32.xlu1 %v279_v8  ;;  %v102_v8 = vld [vmem:[#allocation2 + $0xf8] sm:$0xff] }
  0x9f   :  { %277 = vadd.xlane.f32.xlu0 %v276_v9  ;;  %v387_v9 = vsel %vm203_vm0, %v200_v2, 0.0 }
  0xa2   :  { %355 = vadd.xlane.f32.xlu1 %v354_v16  ;;  %v170_v16 = vmul.f32 %v1770_v38, %v102_v8 }
  0xa3   :  { %346 = vadd.xlane.f32.xlu0 %v345_v17  ;;  %v133_v17 = vld [vmem:[#allocation2 + $0x1f0] sm:$0xff] }
  0xa4   :  { %v297_v6 = vsel %vm203_vm0, %v170_v16, 0.0  ;;  %v201_v19 = vmul.f32 %v1750_v11, %v133_v17 }
  0xa6   :  { %364 = vadd.xlane.f32.xlu1 %v363_v22  ;;  %v390_v21 = vsel %vm203_vm0, %v201_v19, 0.0  ;;  %v393_v22 = vsel %vm203_vm0, %v202_v20, 0.0 }
  0xa7   :  { %361 = vadd.xlane.f32.xlu0 %v360_v23  ;;  %v396_v23 = vld [vmem:[#allocation7] sm:$0xff] }
  0xa8   :  { %v1459_v25 = vpack.c.bf16 %v397_v24, %v396_v23  ;;  %v464_v23 = vlaneseq }
  0xaa   :  { %283 = vadd.xlane.f32.xlu1 %v282_v28  ;;  %1460 = vmatprep.subr.bf16.mxu0 %v1459_v25  ;;  %v1463_v28 = vpack.c.bf16 %v399_v27, %v398_v26  ;;  %v465_v26 = vand.u32 127, %v464_v23  ;;  %v2020_v61 = vshrl.u32 %v464_v23, 7 }
  0xab   :  { %274 = vadd.xlane.f32.xlu0 %v273_v29  ;;  %1462 = vmatpush3.bf16.msra.mxu0 %v1459_v25 }
  0xac   :  { %1464 = vmatprep.subr.bf16.mxu0 %v1463_v28  ;;  %v470_v62 = vadd.s32 4294967288, %v465_v26  ;;  %v477_v55 = vadd.s32 4294967280, %v465_v26  ;;  %v484_v39 = vadd.s32 4294967272, %v465_v26  ;;  %v2030_v56 = vsub.s32 %v465_v26, %v2020_v61 }
  0xae   :  { %292 = vadd.xlane.f32.xlu1 %v291_v34  ;;  %v2027_v32 = vsub.s32 %v470_v62, %v2020_v61  ;;  %v2033_v15 = vsub.s32 %v477_v55, %v2020_v61  ;;  %v2040_v23 = vsub.s32 %v484_v39, %v2020_v61 }
  0xaf   :  { %289 = vadd.xlane.f32.xlu0 %v288_v35  ;;  %1466 = vmatpush3.bf16.msra.mxu0 %v1463_v28 }
  0xb2   :  { %367 = vadd.xlane.f32.xlu1 %v366_v41 }
  0xb3   :  { %358 = vadd.xlane.f32.xlu0 %v357_v42 }
  0xb6   :  { %376 = vadd.xlane.f32.xlu1 %v375_v49 }
  0xb7   :  { %373 = vadd.xlane.f32.xlu0 %v372_v52 }
  0xba   :  { %295 = vadd.xlane.f32.xlu1 %v294_v57 }
  0xbb   :  { %286 = vadd.xlane.f32.xlu0 %v285_v58 }
  0xbe   :  { %379 = vadd.xlane.f32.xlu1 %v378_v63 }
  0xbf   :  { %370 = vadd.xlane.f32.xlu0 %v369_v0 }
  0xc2   :  { %388 = vadd.xlane.f32.xlu1 %v387_v9 }
  0xc3   :  { %385 = vadd.xlane.f32.xlu0 %v384_v10 }
  0xc6   :  { %382 = vadd.xlane.f32.xlu1 %v381_v1 }
  0xc7   :  { %298 = vadd.xlane.f32.xlu0 %v297_v6 }
  0xca   :  { %394 = vadd.xlane.f32.xlu1 %v393_v22 }
  0xcb   :  { %391 = vadd.xlane.f32.xlu0 %v390_v21 }
  0xdb   :  { %v1932_v11 = vpop.xlane.xlu1 %217 }
  0xdc   :  { %v1934_v38 = vpop.xlane.xlu0 %205  ;;  %v494_v55 = vrot.slane %v1932_v11, %v2030_v56 }
  0xdd   :  { %v469_v26 = vrot.slane %v1934_v38, %v2030_v56 }
  0xdf   :  { %v1936_v29 = vpop.xlane.xlu1 %220 }
  0xe0   :  { %v1938_v30 = vpop.xlane.xlu0 %208  ;;  %v498_v33 = vrot.slane %v1936_v29, %v2027_v32 }
  0xe1   :  { %v474_v62 = vrot.slane %v1938_v30, %v2027_v32 }
  0xe3   :  { %v1940_v31 = vpop.xlane.xlu1 %223 }
  0xe4   :  { %v1942_v34 = vpop.xlane.xlu0 %211  ;;  %v503_v51 = vrot.slane %v1940_v31, %v2033_v15  ;;  %v499_v31 = vsel %vm475_vm1, %v498_v33, %v494_v55 }
  0xe5   :  { %v481_v39 = vrot.slane %v1942_v34, %v2033_v15 }
  0xe6   :  { %v504_v33 = vsel %vm482_vm2, %v503_v51, %v499_v31 }
  0xe7   :  { %v1944_v35 = vpop.xlane.xlu1 %232 }
  0xe8   :  { %v1946_v36 = vpop.xlane.xlu0 %229  ;;  %v517_v30 = vrot.slane %v1944_v35, %v2027_v32  ;;  %v476_v35 = vsel %vm475_vm1, %v474_v62, %v469_v26 }
  0xe9   :  { %v513_v44 = vrot.slane %v1946_v36, %v2030_v56  ;;  %v483_v55 = vsel %vm482_vm2, %v481_v39, %v476_v35 }
  0xeb   :  { %v1948_v37 = vpop.xlane.xlu1 %304 }
  0xec   :  { %v1950_v41 = vpop.xlane.xlu0 %301  ;;  %v631_v34 = vrot.slane %v1948_v37, %v2027_v32 }
  0xed   :  { %v627_v7 = vrot.slane %v1950_v41, %v2030_v56 }
  0xef   :  { %v1952_v42 = vpop.xlane.xlu1 %316 }
  0xf0   :  { %v1954_v43 = vpop.xlane.xlu0 %313  ;;  %v650_v36 = vrot.slane %v1952_v42, %v2027_v32  ;;  %v518_v42 = vsel %vm475_vm1, %v517_v30, %v513_v44 }
  0xf3   :  { %v1956_v46 = vpop.xlane.xlu1 %226 }
  0xf4   :  { %v1958_v47 = vpop.xlane.xlu0 %214  ;;  %v508_v11 = vrot.slane %v1956_v46, %v2040_v23  ;;  %v646_v46 = vrot.slane %v1954_v43, %v2030_v56 }
  0xf5   :  { %v488_v38 = vrot.slane %v1958_v47, %v2040_v23 }
  0xf6   :  { %v509_v26 = vsel %vm489_vm3, %v508_v11, %v504_v33  ;;  %v651_v31 = vsel %vm475_vm1, %v650_v36, %v646_v46 }
  0xf7   :  { %v1960_v48 = vpop.xlane.xlu1 %241  ;;  %v490_v43 = vsel %vm489_vm3, %v488_v38, %v483_v55 }
  0xf8   :  { %v1962_v49 = vpop.xlane.xlu0 %235 }
  0xf9   :  { %v522_v47 = vrot.slane %v1962_v49, %v2033_v15  ;;  %v632_v49 = vsel %vm475_vm1, %v631_v34, %v627_v7  ;;  %v777_v7 = vsel %vm776_vm4, %v509_v26, %v490_v43 }
  0xfb   :  { %v1964_v52 = vpop.xlane.xlu1 %307  ;;  %v523_v44 = vsel %vm482_vm2, %v522_v47, %v518_v42 }
  0xfc   :  { %v1966_v53 = vpop.xlane.xlu0 %244  ;;  %v636_v51 = vrot.slane %v1964_v52, %v2033_v15  ;;  %v532_v52 = vrot.slane %v1960_v48, %v2030_v56 }
  0xfd   :  { %v536_v39 = vrot.slane %v1966_v53, %v2027_v32 }
  0xfe   :  { %v637_v36 = vsel %vm482_vm2, %v636_v51, %v632_v49 }
  0xff   :  { %v1968_v54 = vpop.xlane.xlu1 %325 }
 0x100   :  { %v1970_v57 = vpop.xlane.xlu0 %319 }
 0x103   :  { %v1972_v58 = vpop.xlane.xlu1 %238 }
 0x104   :  { %v1974_v59 = vpop.xlane.xlu0 %328  ;;  %v527_v37 = vrot.slane %v1972_v58, %v2040_v23  ;;  %v655_v58 = vrot.slane %v1970_v57, %v2033_v15 }
 0x105   :  { %v669_v30 = vrot.slane %v1974_v59, %v2027_v32  ;;  %v665_v59 = vrot.slane %v1968_v54, %v2030_v56 }
 0x106   :  { %v528_v53 = vsel %vm489_vm3, %v527_v37, %v523_v44  ;;  %v656_v46 = vsel %vm482_vm2, %v655_v58, %v651_v31 }
 0x107   :  { %v1976_v60 = vpop.xlane.xlu1 %253  ;;  %v779_v54 = vsel %vm778_vm5, %v528_v53, %v777_v7 }
 0x108   :  { %v1978_v63 = vpop.xlane.xlu0 %247 }
 0x109   :  { %v541_v11 = vrot.slane %v1978_v63, %v2033_v15 }
 0x10b   :  { %v1980_v0 = vpop.xlane.xlu1 %310 }
 0x10c   :  { %v1982_v2 = vpop.xlane.xlu0 %256  ;;  %v641_v57 = vrot.slane %v1980_v0, %v2040_v23  ;;  %v537_v0 = vsel %vm475_vm1, %v536_v39, %v532_v52 }
 0x10d   :  { %v555_v63 = vrot.slane %v1982_v2, %v2027_v32  ;;  %v670_v2 = vsel %vm475_vm1, %v669_v30, %v665_v59  ;;  %v542_v33 = vsel %vm482_vm2, %v541_v11, %v537_v0 }
 0x10f   :  { %v1984_v3 = vpop.xlane.xlu1 %331 }
 0x110   :  { %v1986_v8 = vpop.xlane.xlu0 %322  ;;  %v674_v47 = vrot.slane %v1984_v3, %v2033_v15 }
 0x111   :  { %v660_v35 = vrot.slane %v1986_v8, %v2040_v23  ;;  %v551_v8 = vrot.slane %v1976_v60, %v2030_v56 }
 0x113   :  { %v1988_v9 = vpop.xlane.xlu1 %340  ;;  %v556_v43 = vsel %vm475_vm1, %v555_v63, %v551_v8  ;;  %v661_v60 = vsel %vm489_vm3, %v660_v35, %v656_v46 }
 0x114   :  { %v1990_v10 = vpop.xlane.xlu0 %337  ;;  %v688_v55 = vrot.slane %v1988_v9, %v2027_v32  ;;  %v675_v9 = vsel %vm482_vm2, %v674_v47, %v670_v2 }
 0x115   :  { %v684_v37 = vrot.slane %v1990_v10, %v2030_v56 }
 0x117   :  { %v1992_v12 = vpop.xlane.xlu1 %259 }
 0x118   :  { %v1994_v16 = vpop.xlane.xlu0 %250  ;;  %v560_v3 = vrot.slane %v1992_v12, %v2033_v15 }
 0x119   :  { %v546_v48 = vrot.slane %v1994_v16, %v2040_v23  ;;  %v642_v16 = vsel %vm489_vm3, %v641_v57, %v637_v36 }
 0x11a   :  { %v561_v30 = vsel %vm482_vm2, %v560_v3, %v556_v43 }
 0x11b   :  { %v1996_v17 = vpop.xlane.xlu1 %268  ;;  %v547_v49 = vsel %vm489_vm3, %v546_v48, %v542_v33 }
 0x11c   :  { %v1998_v18 = vpop.xlane.xlu0 %265  ;;  %v574_v10 = vrot.slane %v1996_v17, %v2027_v32  ;;  %v790_v17 = vsel %vm776_vm4, %v661_v60, %v642_v16 }
 0x11d   :  { %v570_v12 = vrot.slane %v1998_v18, %v2030_v56  ;;  %v689_v18 = vsel %vm475_vm1, %v688_v55, %v684_v37 }
 0x11f   :  { %v2000_v1 = vpop.xlane.xlu1 %343  ;;  %v575_v52 = vsel %vm475_vm1, %v574_v10, %v570_v12 }
 0x120   :  { %v2002_v6 = vpop.xlane.xlu0 %334  ;;  %v693_v39 = vrot.slane %v2000_v1, %v2033_v15  ;;  %v781_v1 = vsel %vm780_vm6, %v547_v49, %v779_v54 }
 0x121   :  { %v679_v58 = vrot.slane %v2002_v6, %v2040_v23 }
 0x122   :  { %v694_v53 = vsel %vm482_vm2, %v693_v39, %v689_v18 }
 0x123   :  { %v2004_v19 = vpop.xlane.xlu1 %352 }
 0x124   :  { %v2006_v20 = vpop.xlane.xlu0 %349  ;;  %v707_v31 = vrot.slane %v2004_v19, %v2027_v32 }
 0x127   :  { %v2008_v21 = vpop.xlane.xlu1 %271 }
 0x128   :  { %v2010_v22 = vpop.xlane.xlu0 %262  ;;  %v579_v44 = vrot.slane %v2008_v21, %v2033_v15 }
 0x129   :  { %v565_v51 = vrot.slane %v2010_v22, %v2040_v23  ;;  %v703_v22 = vrot.slane %v2006_v20, %v2030_v56 }
 0x12b   :  { %v2012_v24 = vpop.xlane.xlu1 %280  ;;  %v566_v6 = vsel %vm489_vm3, %v565_v51, %v561_v30  ;;  %v708_v63 = vsel %vm475_vm1, %v707_v31, %v703_v22 }
 0x12c   :  { %v2014_v25 = vpop.xlane.xlu0 %277  ;;  %v593_v19 = vrot.slane %v2012_v24, %v2027_v32  ;;  %v680_v24 = vsel %vm489_vm3, %v679_v58, %v675_v9  ;;  %v783_v0 = vsel %vm782_vm7, %v566_v6, %v781_v1 }
 0x12d   :  { %v589_v20 = vrot.slane %v2014_v25, %v2030_v56  ;;  %v580_v25 = vsel %vm482_vm2, %v579_v44, %v575_v52  ;;  %v791_v31 = vsel %vm778_vm5, %v680_v24, %v790_v17 }
 0x12f   :  { %v2016_v27 = vpop.xlane.xlu1 %355  ;;  %v594_v46 = vsel %vm475_vm1, %v593_v19, %v589_v20 }
 0x130   :  { %v2018_v28 = vpop.xlane.xlu0 %346  ;;  %v712_v21 = vrot.slane %v2016_v27, %v2033_v15 }
 0x131   :  { %v698_v57 = vrot.slane %v2018_v28, %v2040_v23 }
 0x132   :  { %v713_v47 = vsel %vm482_vm2, %v712_v21, %v708_v63 }
 0x133   :  { %v2022_v4 = vpop.xlane.xlu1 %364 }
 0x134   :  { %v2024_v40 = vpop.xlane.xlu0 %361  ;;  %v726_v35 = vrot.slane %v2022_v4, %v2027_v32  ;;  %v699_v4 = vsel %vm489_vm3, %v698_v57, %v694_v53 }
 0x135   :  { %v722_v48 = vrot.slane %v2024_v40, %v2030_v56  ;;  %v792_v30 = vsel %vm780_vm6, %v699_v4, %v791_v31  ;;  %v1037_v4 = vsub.s32 3, %v2020_v61  ;;  %v1483_v31 = vld [vmem:[#allocation2 + $0x100] sm:$0xff] }
 0x137   :  { %v2035_v14 = vpop.xlane.xlu1 %283  ;;  %v727_v55 = vsel %vm475_vm1, %v726_v35, %v722_v48 }
 0x138   :  { %v2037_v5 = vpop.xlane.xlu0 %274  ;;  %v598_v27 = vrot.slane %v2035_v14, %v2033_v15 }
 0x139   :  { %v584_v59 = vrot.slane %v2037_v5, %v2040_v23 }
 0x13a   :  { %v599_v33 = vsel %vm482_vm2, %v598_v27, %v594_v46  ;;  %v999_v46 = vsub.s32 1, %v2020_v61 }
 0x13b   :  { %v2054_v50 = vpop.xlane.xlu1 %292  ;;  %v585_v40 = vsel %vm489_vm3, %v584_v59, %v580_v25 }
 0x13c   :  { %v2056_v29 = vpop.xlane.xlu0 %289  ;;  %v612_v54 = vrot.slane %v2054_v50, %v2027_v32 }
 0x13d   :  { %v608_v14 = vrot.slane %v2056_v29, %v2030_v56 }
 0x13f   :  { %v2082_v41 = vpop.xlane.xlu1 %367  ;;  %v613_v43 = vsel %vm475_vm1, %v612_v54, %v608_v14  ;;  %v1018_v54 = vsub.s32 2, %v2020_v61 }
 0x140   :  { %v2084_v62 = vpop.xlane.xlu0 %358  ;;  %v731_v2 = vrot.slane %v2082_v41, %v2033_v15 }
 0x141   :  { %v717_v16 = vrot.slane %v2084_v62, %v2040_v23 }
 0x143   :  { %v2108_v38 = vpop.xlane.xlu1 %376  ;;  %v718_v10 = vsel %vm489_vm3, %v717_v16, %v713_v47 }
 0x144   :  { %v2110_v34 = vpop.xlane.xlu0 %373  ;;  %v745_v50 = vrot.slane %v2108_v38, %v2027_v32  ;;  %v785_v38 = vsel %vm784_vm8, %v585_v40, %v783_v0  ;;  %v793_v17 = vsel %vm782_vm7, %v718_v10, %v792_v30 }
 0x145   :  { %v741_v29 = vrot.slane %v2110_v34, %v2030_v56  ;;  %v732_v34 = vsel %vm482_vm2, %v731_v2, %v727_v55 }
 0x147   :  { %v2137_v42 = vpop.xlane.xlu1 %295  ;;  %v746_v12 = vsel %vm475_vm1, %v745_v50, %v741_v29  ;;  %v1075_v50 = vsub.s32 5, %v2020_v61 }
 0x148   :  { %v287_v26 = vpop.xlane.xlu0 %286  ;;  %v617_v8 = vrot.slane %v2137_v42, %v2033_v15 }
 0x149   :  { %v603_v28 = vrot.slane %v287_v26, %v2040_v23 }
 0x14a   :  { %v618_v9 = vsel %vm482_vm2, %v617_v8, %v613_v43 }
 0x14b   :  { %v380_v11 = vpop.xlane.xlu1 %379  ;;  %v604_v42 = vsel %vm489_vm3, %v603_v28, %v599_v33  ;;  %v1056_v33 = vsub.s32 4, %v2020_v61 }
 0x14c   :  { %v371_v7 = vpop.xlane.xlu0 %370  ;;  %v750_v37 = vrot.slane %v380_v11, %v2033_v15  ;;  %v787_v58 = vsel %vm786_vm9, %v604_v42, %v785_v38 }
 0x14d   :  { %v736_v41 = vrot.slane %v371_v7, %v2040_v23 }
 0x14e   :  { %v751_v22 = vsel %vm482_vm2, %v750_v37, %v746_v12 }
 0x14f   :  { %v389_v36 = vpop.xlane.xlu1 %388  ;;  %v737_v44 = vsel %vm489_vm3, %v736_v41, %v732_v34  ;;  %v1094_v41 = vsub.s32 6, %v2020_v61 }
 0x150   :  { %v386_v5 = vpop.xlane.xlu0 %385  ;;  %v764_v49 = vrot.slane %v389_v36, %v2027_v32  ;;  %v794_v19 = vsel %vm784_vm8, %v737_v44, %v793_v17  ;;  %v980_v36 = vsub.s32 0, %v2020_v61 }
 0x151   :  { %v760_v51 = vrot.slane %v386_v5, %v2030_v56 }
 0x153   :  { %v383_v3 = vpop.xlane.xlu1 %382  ;;  %v765_v6 = vsel %vm475_vm1, %v764_v49, %v760_v51 }
 0x154   :  { %v299_v26 = vpop.xlane.xlu0 %298  ;;  %v755_v62 = vrot.slane %v383_v3, %v2040_v23 }
 0x155   :  { %v622_v60 = vrot.slane %v299_v26, %v2040_v23  ;;  %v1113_v26 = vsub.s32 7, %v2020_v61 }
 0x156   :  { %v756_v1 = vsel %vm489_vm3, %v755_v62, %v751_v22 }
 0x157   :  { %v623_v39 = vsel %vm489_vm3, %v622_v60, %v618_v9  ;;  %v395_v32 = vpop.xlane.xlu1 %394  ;;  %v795_v52 = vsel %vm786_vm9, %v756_v1, %v794_v19 }
 0x158   :  { %v392_v18 = vpop.xlane.xlu0 %391  ;;  %v789_v56 = vsel %vm788_vm10, %v623_v39, %v787_v58  ;;  %v774_v7 = vrot.slane %v395_v32, %v2040_v23  ;;  %v1482_v39 = vld [vmem:[#allocation2 + $0x108] sm:$0xff] }
 0x159   :  { %v769_v11 = vrot.slane %v392_v18, %v2033_v15  ;;  %1451 = vmatprep.mubr.msk.f32.mxu0 %vm797_vm11, %v789_v56  ;;  %v879_v15 = vld [vmem:[#allocation8] sm:$0x3]  ;;  %v1484_v56 = vld [vmem:[#allocation2 + $0x110] sm:$0xff] }
 0x15a   :  { %1454 = vmatprep.subr.msk.mxu1 %vm887_vm12, %v879_v15 }
 0x15b   :  { %v770_v20 = vsel %vm482_vm2, %v769_v11, %v765_v6  ;;  %1455 = vmatpush3.msk.msra.mxu1 %vm887_vm12, %v879_v15  ;;  %v1486_v6 = vld [vmem:[#allocation2 + $0x120] sm:$0xff] }
 0x15c   :  { %v775_v21 = vsel %vm489_vm3, %v774_v7, %v770_v20  ;;  %v1485_v7 = vld [vmem:[#allocation2 + $0x128] sm:$0xff] }
 0x15d   :  { %v796_v53 = vsel %vm788_vm10, %v775_v21, %v795_v52  ;;  %v1487_v21 = vld [vmem:[#allocation2 + $0x138] sm:$0xff] }
 0x15e   :  { %1452 = vmatmul.mubr.msk.f32.vlgmr.msra.gmra.mrb[0].mxu0 %vm797_vm11, %v796_v53  ;;  %v1488_v53 = vld [vmem:[#allocation2 + $0x130] sm:$0xff] }
 0x231   :  { %v1453_v23 = vpop.f32.mrb[0].mxu0 }
 0x232   :  { %v868_v57 = vpop.f32.mrb[1].mxu0  ;;  %v878_v24 = vmax.f32 %v1453_v23, 0.0 }
 0x233   :  { %v877_v59 = vmax.f32 %v868_v57, 0.0 }
 0x235   :  { %1456 = vmatprep.mubr.msk.f32.mxu1 %vm880_vm13, %v877_v59  ;;  %v1489_v59 = vld [vmem:[#allocation2 + $0x148] sm:$0xff] }
 0x236   :  { %1457 = vmatmul.mubr.msk.f32.vlgmr.msra.gmra.mrb[0].mxu1 %vm880_vm13, %v878_v24 }
 0x309   :  { %v1458_v63 = vpop.f32.mrb[0].mxu1 }
 0x30a   :  { %v967_v25 = vsub.f32 0.0, %v1458_v63  ;;  %v957_v27 = vpop.f32.mrb[1].mxu1  ;;  %v1490_v63 = vld [vmem:[#allocation2 + $0x140] sm:$0xff] }
 0x30b   :  { %v966_v40 = vsub.f32 0.0, %v957_v27 }
 0x30c   :  { %v970_v35 = vmul.f32 1.442695, %v967_v25 }
 0x30d   :  { %v968_v8 = vmul.f32 1.442695, %v966_v40 }
 0x30e   :  { %1474 = vpow2.f32 %v970_v35 }
 0x318   :  { %v1475_v48 = vpop.eup %1474 }
 0x319   :  { %v973_v28 = vadd.f32 1.0, %v1475_v48 }
 0x31b   :  { %1476 = vrcp.f32 %v973_v28  ;;  %v1491_v28 = vld [vmem:[#allocation2 + $0x150] sm:$0xff] }
 0x31c   :  { %1478 = vpow2.f32 %v968_v8  ;;  %v2388_v8 = vld [vmem:[#allocation15_spill] sm:$0xff] }
 0x325   :  { %v1477_v5 = vpop.eup %1476 }
 0x326   :  { %v1133_v0 = vrot.slane %v1477_v5, %v980_v36  ;;  %v1152_v47 = vrot.slane %v1477_v5, %v999_v46  ;;  %v1171_v14 = vrot.slane %v1477_v5, %v1018_v54  ;;  %v1190_v2 = vrot.slane %v1477_v5, %v1037_v4  ;;  %v1479_v29 = vpop.eup %1478 }
 0x327   :  { %v1209_v16 = vrot.slane %v1477_v5, %v1056_v33  ;;  %v1228_v55 = vrot.slane %v1477_v5, %v1075_v50  ;;  %v972_v37 = vadd.f32 1.0, %v1479_v29  ;;  %v1247_v3 = vrot.slane %v1477_v5, %v1094_v41  ;;  %v2389_v29 = vld [vmem:[#allocation16_spill] sm:$0xff] }
 0x328   :  { %1139 = vbcast.lane.b32.xlu1 %v1133_v0, 264  ;;  %1135 = vbcast.lane.b32.xlu0 %v1133_v0, 256  ;;  %v2247_v42 = vrot.slane %v1477_v5, %v1113_v26 }
 0x329   :  { %1480 = vrcp.f32 %v972_v37  ;;  %v2390_v37 = vld [vmem:[#allocation17_spill] sm:$0xff] }
 0x32c   :  { %1147 = vbcast.lane.b32.xlu1 %v1133_v0, 280  ;;  %1143 = vbcast.lane.b32.xlu0 %v1133_v0, 272 }
 0x330   :  { %1158 = vbcast.lane.b32.xlu1 %v1152_v47, 264  ;;  %1154 = vbcast.lane.b32.xlu0 %v1152_v47, 256 }
 0x333   :  { %v1481_v43 = vpop.eup %1480 }
 0x334   :  { %1166 = vbcast.lane.b32.xlu1 %v1152_v47, 280  ;;  %1162 = vbcast.lane.b32.xlu0 %v1152_v47, 272  ;;  %v981_v62 = vrot.slane %v1481_v43, %v980_v36  ;;  %v1000_v60 = vrot.slane %v1481_v43, %v999_v46  ;;  %v1019_v38 = vrot.slane %v1481_v43, %v1018_v54  ;;  %v1492_v46 = vld [vmem:[#allocation2 + $0x168] sm:$0xff]  ;;  %v1493_v54 = vld [vmem:[#allocation2 + $0x160] sm:$0xff] }
 0x335   :  { %v1038_v61 = vrot.slane %v1481_v43, %v1037_v4  ;;  %v1057_v34 = vrot.slane %v1481_v43, %v1056_v33  ;;  %v1076_v49 = vrot.slane %v1481_v43, %v1075_v50  ;;  %v1095_v51 = vrot.slane %v1481_v43, %v1094_v41 }
 0x336   :  { %v1114_v9 = vrot.slane %v1481_v43, %v1113_v26 }
 0x338   :  { %1177 = vbcast.lane.b32.xlu1 %v1171_v14, 264  ;;  %1173 = vbcast.lane.b32.xlu0 %v1171_v14, 256 }
 0x33c   :  { %1185 = vbcast.lane.b32.xlu1 %v1171_v14, 280  ;;  %1181 = vbcast.lane.b32.xlu0 %v1171_v14, 272 }
 0x340   :  { %1196 = vbcast.lane.b32.xlu1 %v1190_v2, 264  ;;  %1192 = vbcast.lane.b32.xlu0 %v1190_v2, 256 }
 0x344   :  { %1204 = vbcast.lane.b32.xlu1 %v1190_v2, 280  ;;  %1200 = vbcast.lane.b32.xlu0 %v1190_v2, 272  ;;  %v2387_v2 = vld [vmem:[#allocation19_spill] sm:$0xff] }
 0x348   :  { %1215 = vbcast.lane.b32.xlu1 %v1209_v16, 264  ;;  %1211 = vbcast.lane.b32.xlu0 %v1209_v16, 256 }
 0x34c   :  { %1223 = vbcast.lane.b32.xlu1 %v1209_v16, 280  ;;  %1219 = vbcast.lane.b32.xlu0 %v1209_v16, 272 }
 0x350   :  { %1234 = vbcast.lane.b32.xlu1 %v1228_v55, 264  ;;  %1230 = vbcast.lane.b32.xlu0 %v1228_v55, 256 }
 0x354   :  { %1242 = vbcast.lane.b32.xlu1 %v1228_v55, 280  ;;  %1238 = vbcast.lane.b32.xlu0 %v1228_v55, 272 }
 0x358   :  { %1253 = vbcast.lane.b32.xlu1 %v1247_v3, 264  ;;  %1249 = vbcast.lane.b32.xlu0 %v1247_v3, 256 }
 0x35c   :  { %1261 = vbcast.lane.b32.xlu1 %v1247_v3, 280  ;;  %1257 = vbcast.lane.b32.xlu0 %v1247_v3, 272 }
 0x360   :  { %1272 = vbcast.lane.b32.xlu1 %v2247_v42, 264  ;;  %1268 = vbcast.lane.b32.xlu0 %v2247_v42, 256 }
 0x364   :  { %987 = vbcast.lane.b32.xlu1 %v981_v62, 264  ;;  %983 = vbcast.lane.b32.xlu0 %v981_v62, 256 }
 0x368   :  { %991 = vbcast.lane.b32.xlu1 %v981_v62, 272  ;;  %1002 = vbcast.lane.b32.xlu0 %v1000_v60, 256 }
 0x36c   :  { %995 = vbcast.lane.b32.xlu1 %v981_v62, 280  ;;  %1010 = vbcast.lane.b32.xlu0 %v1000_v60, 272  ;;  %v2392_v62 = vld [vmem:[#allocation18_spill] sm:$0xff] }
 0x370   :  { %1006 = vbcast.lane.b32.xlu1 %v1000_v60, 264  ;;  %1021 = vbcast.lane.b32.xlu0 %v1019_v38, 256 }
 0x374   :  { %1014 = vbcast.lane.b32.xlu1 %v1000_v60, 280  ;;  %1029 = vbcast.lane.b32.xlu0 %v1019_v38, 272 }
 0x378   :  { %1025 = vbcast.lane.b32.xlu1 %v1019_v38, 264  ;;  %1040 = vbcast.lane.b32.xlu0 %v1038_v61, 256 }
 0x37c   :  { %1033 = vbcast.lane.b32.xlu1 %v1019_v38, 280  ;;  %1048 = vbcast.lane.b32.xlu0 %v1038_v61, 272 }
 0x380   :  { %1044 = vbcast.lane.b32.xlu1 %v1038_v61, 264  ;;  %1059 = vbcast.lane.b32.xlu0 %v1057_v34, 256 }
 0x384   :  { %1052 = vbcast.lane.b32.xlu1 %v1038_v61, 280  ;;  %1067 = vbcast.lane.b32.xlu0 %v1057_v34, 272 }
 0x388   :  { %1063 = vbcast.lane.b32.xlu1 %v1057_v34, 264  ;;  %1078 = vbcast.lane.b32.xlu0 %v1076_v49, 256 }
 0x38c   :  { %1071 = vbcast.lane.b32.xlu1 %v1057_v34, 280  ;;  %1086 = vbcast.lane.b32.xlu0 %v1076_v49, 272  ;;  %v2393_v34 = vld [vmem:[#allocation20_spill] sm:$0xff] }
 0x390   :  { %1082 = vbcast.lane.b32.xlu1 %v1076_v49, 264  ;;  %1097 = vbcast.lane.b32.xlu0 %v1095_v51, 256 }
 0x394   :  { %1090 = vbcast.lane.b32.xlu1 %v1076_v49, 280  ;;  %1105 = vbcast.lane.b32.xlu0 %v1095_v51, 272 }
 0x398   :  { %1101 = vbcast.lane.b32.xlu1 %v1095_v51, 264  ;;  %1116 = vbcast.lane.b32.xlu0 %v1114_v9, 256 }
 0x39a   :  { %v1140_v10 = vpop.permute.xlu1 %1139  ;;  %v1136_v12 = vpop.permute.xlu0 %1135 }
 0x39b   :  { %v1315_v58 = vmul.f32 %v1482_v39, %v1140_v10  ;;  %v1314_v22 = vmul.f32 %v1483_v31, %v1136_v12  ;;  %v2395_v39 = vld [vmem:[#allocation27_spill] sm:$0xff]  ;;  %v2396_v31 = vld [vmem:[#allocation22_spill] sm:$0xff] }
 0x39c   :  { %1109 = vbcast.lane.b32.xlu1 %v1095_v51, 280  ;;  %1124 = vbcast.lane.b32.xlu0 %v1114_v9, 272  ;;  %v2394_v51 = vld [vmem:[#allocation21_spill] sm:$0xff] }
 0x39d   :  { %1379 = vst.msk [vmem:[#allocation10 + $0x108] sm:$0xff] %vm203_vm0, %v1315_v58  ;;  %1378 = vst.msk [vmem:[#allocation10 + $0x100] sm:$0xff] %vm203_vm0, %v1314_v22 }
 0x39e   :  { %v1148_v44 = vpop.permute.xlu1 %1147  ;;  %v1144_v18 = vpop.permute.xlu0 %1143 }
 0x39f   :  { %v1317_v32 = vmul.f32 %v1148_v44, %v1796_v13  ;;  %v1316_v30 = vmul.f32 %v1484_v56, %v1144_v18 }
 0x3a0   :  { %1120 = vbcast.lane.b32.xlu1 %v1114_v9, 264  ;;  %1276 = vbcast.lane.b32.xlu0 %v2247_v42, 272 }
 0x3a1   :  { %1381 = vst.msk [vmem:[#allocation10 + $0x118] sm:$0xff] %vm203_vm0, %v1317_v32  ;;  %1380 = vst.msk [vmem:[#allocation10 + $0x110] sm:$0xff] %vm203_vm0, %v1316_v30  ;;  %v2397_v32 = vld [vmem:[#allocation24_spill] sm:$0xff]  ;;  %v2398_v30 = vld [vmem:[#allocation25_spill] sm:$0xff] }
 0x3a2   :  { %v1159_v1 = vpop.permute.xlu1 %1158  ;;  %v1155_v11 = vpop.permute.xlu0 %1154 }
 0x3a3   :  { %v1319_v17 = vmul.f32 %v1485_v7, %v1159_v1  ;;  %v1318_v19 = vmul.f32 %v1486_v6, %v1155_v11 }
 0x3a4   :  { %1128 = vbcast.lane.b32.xlu1 %v1114_v9, 280 }
 0x3a5   :  { %1383 = vst.msk [vmem:[#allocation10 + $0x128] sm:$0xff] %vm203_vm0, %v1319_v17  ;;  %1382 = vst.msk [vmem:[#allocation10 + $0x120] sm:$0xff] %vm203_vm0, %v1318_v19  ;;  %v2399_v17 = vld [vmem:[#allocation30_spill] sm:$0xff] }
 0x3a6   :  { %v1167_v13 = vpop.permute.xlu1 %1166  ;;  %v1163_v20 = vpop.permute.xlu0 %1162  ;;  %v2400_v19 = vld [vmem:[#allocation26_spill] sm:$0xff] }
 0x3a7   :  { %v1321_v52 = vmul.f32 %v1487_v21, %v1167_v13  ;;  %v1320_v15 = vmul.f32 %v1488_v53, %v1163_v20 }
 0x3a8   :  { %1280 = vbcast.lane.b32.xlu1 %v2247_v42, 280  ;;  %v2391_v42 = vld [vmem:[#allocation23_spill] sm:$0xff] }
 0x3a9   :  { %1385 = vst.msk [vmem:[#allocation10 + $0x138] sm:$0xff] %vm203_vm0, %v1321_v52  ;;  %1384 = vst.msk [vmem:[#allocation10 + $0x130] sm:$0xff] %vm203_vm0, %v1320_v15  ;;  %v2401_v52 = vld [vmem:[#allocation28_spill] sm:$0xff]  ;;  %v2402_v15 = vld [vmem:[#allocation29_spill] sm:$0xff] }
 0x3aa   :  { %v1178_v23 = vpop.permute.xlu1 %1177  ;;  %v1174_v57 = vpop.permute.xlu0 %1173 }
 0x3ab   :  { %v1323_v24 = vmul.f32 %v1489_v59, %v1178_v23  ;;  %v1322_v25 = vmul.f32 %v1490_v63, %v1174_v57 }
 0x3ad   :  { %1387 = vst.msk [vmem:[#allocation10 + $0x148] sm:$0xff] %vm203_vm0, %v1323_v24  ;;  %1386 = vst.msk [vmem:[#allocation10 + $0x140] sm:$0xff] %vm203_vm0, %v1322_v25  ;;  %v1494_v24 = vld [vmem:[#allocation2 + $0x8] sm:$0xff]  ;;  %v1495_v25 = vld [vmem:[#allocation2] sm:$0xff] }
 0x3ae   :  { %v1186_v27 = vpop.permute.xlu1 %1185  ;;  %v1182_v35 = vpop.permute.xlu0 %1181 }
 0x3af   :  { %v1325_v48 = vmul.f32 %v1186_v27, %v1821_v45  ;;  %v1324_v36 = vmul.f32 %v1491_v28, %v1182_v35  ;;  %v1496_v28 = vld [vmem:[#allocation2 + $0x10] sm:$0xff] }
 0x3b1   :  { %1389 = vst.msk [vmem:[#allocation10 + $0x158] sm:$0xff] %vm203_vm0, %v1325_v48  ;;  %1388 = vst.msk [vmem:[#allocation10 + $0x150] sm:$0xff] %vm203_vm0, %v1324_v36 }
 0x3b2   :  { %v1197_v5 = vpop.permute.xlu1 %1196  ;;  %v1193_v0 = vpop.permute.xlu0 %1192 }
 0x3b3   :  { %v1327_v47 = vmul.f32 %v1492_v46, %v1197_v5  ;;  %v1326_v14 = vmul.f32 %v1493_v54, %v1193_v0  ;;  %v1497_v5 = vld [vmem:[#allocation2 + $0x20] sm:$0xff]  ;;  %v1498_v54 = vld [vmem:[#allocation2 + $0x18] sm:$0xff] }
 0x3b5   :  { %1391 = vst.msk [vmem:[#allocation10 + $0x168] sm:$0xff] %vm203_vm0, %v1327_v47  ;;  %1390 = vst.msk [vmem:[#allocation10 + $0x160] sm:$0xff] %vm203_vm0, %v1326_v14 }
 0x3b6   :  { %v1205_v4 = vpop.permute.xlu1 %1204  ;;  %v1201_v40 = vpop.permute.xlu0 %1200 }
 0x3b7   :  { %v1329_v45 = vmul.f32 %v1205_v4, %v2387_v2  ;;  %v1328_v33 = vmul.f32 %v1201_v40, %v2388_v8  ;;  %v1499_v4 = vld [vmem:[#allocation2 + $0x30] sm:$0xff]  ;;  %v1500_v8 = vld [vmem:[#allocation2 + $0x28] sm:$0xff] }
 0x3b9   :  { %1393 = vst.msk [vmem:[#allocation10 + $0x178] sm:$0xff] %vm203_vm0, %v1329_v45  ;;  %1392 = vst.msk [vmem:[#allocation10 + $0x170] sm:$0xff] %vm203_vm0, %v1328_v33 }
 0x3ba   :  { %v1216_v16 = vpop.permute.xlu1 %1215  ;;  %v1212_v50 = vpop.permute.xlu0 %1211 }
 0x3bb   :  { %v1331_v55 = vmul.f32 %v1216_v16, %v2389_v29  ;;  %v1330_v41 = vmul.f32 %v1212_v50, %v2390_v37  ;;  %v1501_v16 = vld [vmem:[#allocation2 + $0x40] sm:$0xff]  ;;  %v1502_v37 = vld [vmem:[#allocation2 + $0x38] sm:$0xff] }
 0x3bd   :  { %1395 = vst.msk [vmem:[#allocation10 + $0x188] sm:$0xff] %vm203_vm0, %v1331_v55  ;;  %1394 = vst.msk [vmem:[#allocation10 + $0x180] sm:$0xff] %vm203_vm0, %v1330_v41 }
 0x3be   :  { %v1224_v3 = vpop.permute.xlu1 %1223  ;;  %v1220_v26 = vpop.permute.xlu0 %1219 }
 0x3bf   :  { %v1333_v43 = vmul.f32 %v1224_v3, %v2391_v42  ;;  %v1332_v60 = vmul.f32 %v1220_v26, %v2392_v62  ;;  %v1503_v3 = vld [vmem:[#allocation2 + $0x50] sm:$0xff]  ;;  %v1504_v62 = vld [vmem:[#allocation2 + $0x48] sm:$0xff] }
 0x3c1   :  { %1397 = vst.msk [vmem:[#allocation10 + $0x198] sm:$0xff] %vm203_vm0, %v1333_v43  ;;  %1396 = vst.msk [vmem:[#allocation10 + $0x190] sm:$0xff] %vm203_vm0, %v1332_v60 }
 0x3c2   :  { %v1235_v38 = vpop.permute.xlu1 %1234  ;;  %v1231_v61 = vpop.permute.xlu0 %1230 }
 0x3c3   :  { %v1335_v49 = vmul.f32 %v1235_v38, %v2393_v34  ;;  %v1334_v9 = vmul.f32 %v1231_v61, %v2394_v51  ;;  %v1505_v38 = vld [vmem:[#allocation2 + $0x60] sm:$0xff]  ;;  %v1506_v51 = vld [vmem:[#allocation2 + $0x58] sm:$0xff] }
 0x3c5   :  { %1399 = vst.msk [vmem:[#allocation10 + $0x1a8] sm:$0xff] %vm203_vm0, %v1335_v49  ;;  %1398 = vst.msk [vmem:[#allocation10 + $0x1a0] sm:$0xff] %vm203_vm0, %v1334_v9 }
 0x3c6   :  { %v1243_v10 = vpop.permute.xlu1 %1242  ;;  %v1239_v12 = vpop.permute.xlu0 %1238 }
 0x3c7   :  { %v1337_v58 = vmul.f32 %v1243_v10, %v2395_v39  ;;  %v1336_v22 = vmul.f32 %v1239_v12, %v2396_v31  ;;  %v1507_v10 = vld [vmem:[#allocation2 + $0x70] sm:$0xff]  ;;  %v1508_v31 = vld [vmem:[#allocation2 + $0x68] sm:$0xff] }
 0x3c9   :  { %1401 = vst.msk [vmem:[#allocation10 + $0x1b8] sm:$0xff] %vm203_vm0, %v1337_v58  ;;  %1400 = vst.msk [vmem:[#allocation10 + $0x1b0] sm:$0xff] %vm203_vm0, %v1336_v22 }
 0x3ca   :  { %v1254_v44 = vpop.permute.xlu1 %1253  ;;  %v1250_v18 = vpop.permute.xlu0 %1249 }
 0x3cb   :  { %v1339_v56 = vmul.f32 %v1254_v44, %v2397_v32  ;;  %v1338_v1 = vmul.f32 %v1250_v18, %v2398_v30  ;;  %v1509_v44 = vld [vmem:[#allocation2 + $0x80] sm:$0xff]  ;;  %v1510_v30 = vld [vmem:[#allocation2 + $0x78] sm:$0xff] }
 0x3cd   :  { %1403 = vst.msk [vmem:[#allocation10 + $0x1c8] sm:$0xff] %vm203_vm0, %v1339_v56  ;;  %1402 = vst.msk [vmem:[#allocation10 + $0x1c0] sm:$0xff] %vm203_vm0, %v1338_v1 }
 0x3ce   :  { %v1262_v11 = vpop.permute.xlu1 %1261  ;;  %v1258_v7 = vpop.permute.xlu0 %1257 }
 0x3cf   :  { %v1341_v6 = vmul.f32 %v1262_v11, %v2399_v17  ;;  %v1340_v13 = vmul.f32 %v1258_v7, %v2400_v19  ;;  %v1511_v11 = vld [vmem:[#allocation2 + $0x90] sm:$0xff]  ;;  %v1512_v19 = vld [vmem:[#allocation2 + $0x88] sm:$0xff] }
 0x3d1   :  { %1405 = vst.msk [vmem:[#allocation10 + $0x1d8] sm:$0xff] %vm203_vm0, %v1341_v6  ;;  %1404 = vst.msk [vmem:[#allocation10 + $0x1d0] sm:$0xff] %vm203_vm0, %v1340_v13 }
 0x3d2   :  { %v1273_v20 = vpop.permute.xlu1 %1272  ;;  %v1269_v21 = vpop.permute.xlu0 %1268 }
 0x3d3   :  { %v1343_v53 = vmul.f32 %v1273_v20, %v2401_v52  ;;  %v1342_v23 = vmul.f32 %v1269_v21, %v2402_v15  ;;  %v1513_v20 = vld [vmem:[#allocation2 + $0xa0] sm:$0xff]  ;;  %v1514_v15 = vld [vmem:[#allocation2 + $0x98] sm:$0xff] }
 0x3d5   :  { %1407 = vst.msk [vmem:[#allocation10 + $0x1e8] sm:$0xff] %vm203_vm0, %v1343_v53  ;;  %1406 = vst.msk [vmem:[#allocation10 + $0x1e0] sm:$0xff] %vm203_vm0, %v1342_v23 }
 0x3d6   :  { %v988_v57 = vpop.permute.xlu1 %987  ;;  %v984_v59 = vpop.permute.xlu0 %983 }
 0x3d7   :  { %v1283_v63 = vmul.f32 %v1494_v24, %v988_v57  ;;  %v1282_v27 = vmul.f32 %v1495_v25, %v984_v59  ;;  %v1515_v57 = vld [vmem:[#allocation2 + $0xb0] sm:$0xff]  ;;  %v1516_v25 = vld [vmem:[#allocation2 + $0xa8] sm:$0xff] }
 0x3d9   :  { %1347 = vst.msk [vmem:[#allocation10 + $0x8] sm:$0xff] %vm203_vm0, %v1283_v63  ;;  %1346 = vst.msk [vmem:[#allocation10] sm:$0xff] %vm203_vm0, %v1282_v27 }
 0x3da   :  { %v992_v35 = vpop.permute.xlu1 %991  ;;  %v1003_v48 = vpop.permute.xlu0 %1002 }
 0x3db   :  { %v1284_v36 = vmul.f32 %v1496_v28, %v992_v35  ;;  %v1286_v0 = vmul.f32 %v1497_v5, %v1003_v48  ;;  %v1517_v35 = vld [vmem:[#allocation2 + $0xc0] sm:$0xff]  ;;  %v1518_v5 = vld [vmem:[#allocation2 + $0xb8] sm:$0xff] }
 0x3dd   :  { %1348 = vst.msk [vmem:[#allocation10 + $0x10] sm:$0xff] %vm203_vm0, %v1284_v36  ;;  %1350 = vst.msk [vmem:[#allocation10 + $0x20] sm:$0xff] %vm203_vm0, %v1286_v0 }
 0x3de   :  { %v996_v46 = vpop.permute.xlu1 %995  ;;  %v1011_v47 = vpop.permute.xlu0 %1010 }
 0x3df   :  { %v1285_v14 = vmul.f32 %v1498_v54, %v996_v46  ;;  %v1288_v40 = vmul.f32 %v1499_v4, %v1011_v47  ;;  %v1519_v46 = vld [vmem:[#allocation2 + $0xd0] sm:$0xff]  ;;  %v1520_v4 = vld [vmem:[#allocation2 + $0xc8] sm:$0xff] }
 0x3e1   :  { %1349 = vst.msk [vmem:[#allocation10 + $0x18] sm:$0xff] %vm203_vm0, %v1285_v14  ;;  %1352 = vst.msk [vmem:[#allocation10 + $0x30] sm:$0xff] %vm203_vm0, %v1288_v40 }
 0x3e2   :  { %v1007_v2 = vpop.permute.xlu1 %1006  ;;  %v1022_v45 = vpop.permute.xlu0 %1021 }
 0x3e3   :  { %v1287_v33 = vmul.f32 %v1500_v8, %v1007_v2  ;;  %v1290_v50 = vmul.f32 %v1501_v16, %v1022_v45  ;;  %v1521_v2 = vld [vmem:[#allocation2 + $0xe0] sm:$0xff]  ;;  %v1522_v16 = vld [vmem:[#allocation2 + $0xd8] sm:$0xff] }
 0x3e5   :  { %1351 = vst.msk [vmem:[#allocation10 + $0x28] sm:$0xff] %vm203_vm0, %v1287_v33  ;;  %1354 = vst.msk [vmem:[#allocation10 + $0x40] sm:$0xff] %vm203_vm0, %v1290_v50 }
 0x3e6   :  { %v1015_v29 = vpop.permute.xlu1 %1014  ;;  %v1030_v55 = vpop.permute.xlu0 %1029 }
 0x3e7   :  { %v1289_v41 = vmul.f32 %v1502_v37, %v1015_v29  ;;  %v1292_v26 = vmul.f32 %v1503_v3, %v1030_v55  ;;  %v1523_v29 = vld [vmem:[#allocation2 + $0xf0] sm:$0xff]  ;;  %v1524_v3 = vld [vmem:[#allocation2 + $0xe8] sm:$0xff] }
 0x3e9   :  { %1353 = vst.msk [vmem:[#allocation10 + $0x38] sm:$0xff] %vm203_vm0, %v1289_v41  ;;  %1356 = vst.msk [vmem:[#allocation10 + $0x50] sm:$0xff] %vm203_vm0, %v1292_v26 }
 0x3ea   :  { %v1026_v42 = vpop.permute.xlu1 %1025  ;;  %v1041_v43 = vpop.permute.xlu0 %1040 }
 0x3eb   :  { %v1291_v60 = vmul.f32 %v1504_v62, %v1026_v42  ;;  %v1294_v61 = vmul.f32 %v1505_v38, %v1041_v43  ;;  %v1525_v42 = vld [vmem:[#allocation2 + $0x1f0] sm:$0xff] }
 0x3ed   :  { %1355 = vst.msk [vmem:[#allocation10 + $0x48] sm:$0xff] %vm203_vm0, %v1291_v60  ;;  %1358 = vst.msk [vmem:[#allocation10 + $0x60] sm:$0xff] %vm203_vm0, %v1294_v61  ;;  %v1526_v60 = vld [vmem:[#allocation2 + $0xf8] sm:$0xff] }
 0x3ee   :  { %v1034_v34 = vpop.permute.xlu1 %1033  ;;  %v1049_v49 = vpop.permute.xlu0 %1048 }
 0x3ef   :  { %v1293_v9 = vmul.f32 %v1506_v51, %v1034_v34  ;;  %v1296_v12 = vmul.f32 %v1507_v10, %v1049_v49  ;;  %v1527_v34 = vld [vmem:[#allocation2 + $0x1f8] sm:$0xff] }
 0x3f1   :  { %1357 = vst.msk [vmem:[#allocation10 + $0x58] sm:$0xff] %vm203_vm0, %v1293_v9  ;;  %1360 = vst.msk [vmem:[#allocation10 + $0x70] sm:$0xff] %vm203_vm0, %v1296_v12 }
 0x3f2   :  { %v1045_v39 = vpop.permute.xlu1 %1044  ;;  %v1060_v58 = vpop.permute.xlu0 %1059 }
 0x3f3   :  { %v1295_v22 = vmul.f32 %v1508_v31, %v1045_v39  ;;  %v1298_v18 = vmul.f32 %v1509_v44, %v1060_v58 }
 0x3f5   :  { %1359 = vst.msk [vmem:[#allocation10 + $0x68] sm:$0xff] %vm203_vm0, %v1295_v22  ;;  %1362 = vst.msk [vmem:[#allocation10 + $0x80] sm:$0xff] %vm203_vm0, %v1298_v18 }
 0x3f6   :  { %v1053_v32 = vpop.permute.xlu1 %1052  ;;  %v1068_v56 = vpop.permute.xlu0 %1067 }
 0x3f7   :  { %v1297_v1 = vmul.f32 %v1510_v30, %v1053_v32  ;;  %v1300_v7 = vmul.f32 %v1511_v11, %v1068_v56 }
 0x3f9   :  { %1361 = vst.msk [vmem:[#allocation10 + $0x78] sm:$0xff] %vm203_vm0, %v1297_v1  ;;  %1364 = vst.msk [vmem:[#allocation10 + $0x90] sm:$0xff] %vm203_vm0, %v1300_v7 }
 0x3fa   :  { %v1064_v17 = vpop.permute.xlu1 %1063  ;;  %v1079_v6 = vpop.permute.xlu0 %1078 }
 0x3fb   :  { %v1299_v13 = vmul.f32 %v1512_v19, %v1064_v17  ;;  %v1302_v21 = vmul.f32 %v1513_v20, %v1079_v6 }
 0x3fd   :  { %1363 = vst.msk [vmem:[#allocation10 + $0x88] sm:$0xff] %vm203_vm0, %v1299_v13  ;;  %1366 = vst.msk [vmem:[#allocation10 + $0xa0] sm:$0xff] %vm203_vm0, %v1302_v21 }
 0x3fe   :  { %v1072_v52 = vpop.permute.xlu1 %1071  ;;  %v1087_v53 = vpop.permute.xlu0 %1086 }
 0x3ff   :  { %v1301_v23 = vmul.f32 %v1514_v15, %v1072_v52  ;;  %v1304_v59 = vmul.f32 %v1515_v57, %v1087_v53 }
 0x401   :  { %1365 = vst.msk [vmem:[#allocation10 + $0x98] sm:$0xff] %vm203_vm0, %v1301_v23  ;;  %1368 = vst.msk [vmem:[#allocation10 + $0xb0] sm:$0xff] %vm203_vm0, %v1304_v59 }
 0x402   :  { %v1083_v24 = vpop.permute.xlu1 %1082  ;;  %v1098_v63 = vpop.permute.xlu0 %1097 }
 0x403   :  { %v1303_v27 = vmul.f32 %v1516_v25, %v1083_v24  ;;  %v1306_v48 = vmul.f32 %v1517_v35, %v1098_v63 }
 0x405   :  { %1367 = vst.msk [vmem:[#allocation10 + $0xa8] sm:$0xff] %vm203_vm0, %v1303_v27  ;;  %1370 = vst.msk [vmem:[#allocation10 + $0xc0] sm:$0xff] %vm203_vm0, %v1306_v48 }
 0x406   :  { %v1091_v28 = vpop.permute.xlu1 %1090  ;;  %v1106_v36 = vpop.permute.xlu0 %1105 }
 0x407   :  { %v1305_v0 = vmul.f32 %v1518_v5, %v1091_v28  ;;  %v1308_v47 = vmul.f32 %v1519_v46, %v1106_v36 }
 0x409   :  { %1369 = vst.msk [vmem:[#allocation10 + $0xb8] sm:$0xff] %vm203_vm0, %v1305_v0  ;;  %1372 = vst.msk [vmem:[#allocation10 + $0xd0] sm:$0xff] %vm203_vm0, %v1308_v47 }
 0x40a   :  { %v1102_v54 = vpop.permute.xlu1 %1101  ;;  %v1117_v14 = vpop.permute.xlu0 %1116 }
 0x40b   :  { %v1307_v40 = vmul.f32 %v1520_v4, %v1102_v54  ;;  %v1310_v45 = vmul.f32 %v1521_v2, %v1117_v14 }
 0x40d   :  { %1371 = vst.msk [vmem:[#allocation10 + $0xc8] sm:$0xff] %vm203_vm0, %v1307_v40  ;;  %1374 = vst.msk [vmem:[#allocation10 + $0xe0] sm:$0xff] %vm203_vm0, %v1310_v45 }
 0x40e   :  { %v1110_v8 = vpop.permute.xlu1 %1109  ;;  %v1125_v33 = vpop.permute.xlu0 %1124 }
 0x40f   :  { %v1309_v50 = vmul.f32 %v1522_v16, %v1110_v8  ;;  %v1312_v55 = vmul.f32 %v1523_v29, %v1125_v33 }
 0x411   :  { %1373 = vst.msk [vmem:[#allocation10 + $0xd8] sm:$0xff] %vm203_vm0, %v1309_v50  ;;  %1376 = vst.msk [vmem:[#allocation10 + $0xf0] sm:$0xff] %vm203_vm0, %v1312_v55 }
 0x412   :  { %v1121_v37 = vpop.permute.xlu1 %1120  ;;  %v1277_v41 = vpop.permute.xlu0 %1276 }
 0x413   :  { %v1311_v26 = vmul.f32 %v1524_v3, %v1121_v37  ;;  %v1344_v43 = vmul.f32 %v1525_v42, %v1277_v41 }
 0x415   :  { %1375 = vst.msk [vmem:[#allocation10 + $0xe8] sm:$0xff] %vm203_vm0, %v1311_v26  ;;  %1408 = vst.msk [vmem:[#allocation10 + $0x1f0] sm:$0xff] %vm203_vm0, %v1344_v43 }
 0x416   :  { %v1129_v62 = vpop.permute.xlu1 %1128 }
 0x417   :  { %v1313_v38 = vmul.f32 %v1526_v60, %v1129_v62 }
 0x419   :  { %1377 = vst.msk [vmem:[#allocation10 + $0xf8] sm:$0xff] %vm203_vm0, %v1313_v38 }
 0x41a   :  { %v1281_v61 = vpop.permute.xlu1 %1280 }
 0x41b   :  { %v1345_v49 = vmul.f32 %v1527_v34, %v1281_v61 }
 0x41d   :  { %1409 = vst.msk [vmem:[#allocation10 + $0x1f8] sm:$0xff] %vm203_vm0, %v1345_v49 }
 0x41e   :  { %1627 = shalt.err (!%p1624_p8)
}
 0x41f   :  { %s1628_s15 = scalar_lea.hbm %s2354_s4, 8192 }
 0x420   :  { %p1629_p9 = scmp.ne.s32.totalorder %s2354_s4, %s1628_s15  ;;  %p1632_p10 = scmp.lt.u32.totalorder %s1628_s15, %s2354_s4 }
 0x422   :  { %p1634_p11 = pnand %p1632_p10, %p1629_p9 }
 0x424   :  { %1637 = shalt.err (!%p1634_p11)
}
 0x425   :  { %1421 = dma.vmem_to_hbm [thread:$0]  %s1416_s12, 8192, %s2354_s4, [#allocation4], %s1648_s27, %s1648_s27, %s1649_s28  }
 0x426   :  { %1644 = dma.done.wait [#allocation4], 8192  }
 0x427   :  { %1645 = vsyncadd [#allocation4], 4294959104 }
 0x428   :  { %1425 = vsyncpa [#allocation3], 1 }
 0x429   :  { %1426 = vsyncpa [#allocation6], 1 }
 0x42a   :  { %1427 = vsyncpa [#allocation9], 1 }
 0x42b   :  { %1428 = vsyncpa [#allocation4], 1 }

</bundles_post_ra>
